<compile_context>
chip_gen: v5e
topology: v5e:2x2
jax: 0.10.0
libtpu: 0.0.40
codegen_flags: <defaults>
</compile_context>

<pallas_src>
import numpy as np
import jax
import jax.numpy as jnp
from jax import lax
from jax.experimental import pallas as pl
from jax.experimental.pallas import tpu as pltpu

_VMEM_LIMIT = 48 * 1024 * 1024  # explicit scoped-VMEM limit (safe on v7x 64 MiB)


# ----------------------------- Pallas kernels ------------------------------

def _conv_mm_stats_kernel(a_ref, w_ref, y_ref, s_ref, ss_ref):
    """One M-tile of the transposed im2col conv matmul + partial BN stats.

    a_ref  : (Kp, tm)   bf16 im2col columns (patch features x spatial positions)
    w_ref  : (Co, Kp)   bf16 conv weight matrix
    y_ref  : (Co, tm)   f32 conv output tile (lane-dense: tm is the lane axis)
    s_ref  : (1, Co, 1) f32 per-tile partial sum   (reduced in JAX afterwards)
    ss_ref : (1, Co, 1) f32 per-tile partial sumsq
    """
    y = jnp.dot(w_ref[...], a_ref[...], preferred_element_type=jnp.float32)
    y_ref[...] = y
    s_ref[...] = jnp.sum(y, axis=1, keepdims=True)[None]
    ss_ref[...] = jnp.sum(y * y, axis=1, keepdims=True)[None]


def _bn_relu_kernel(x_ref, scale_ref, shift_ref, o_ref):
    """Fused BatchNorm normalize (precomputed per-channel scale/shift) + ReLU.

    x_ref/o_ref : (Co, tm) f32, scale_ref/shift_ref : (Co, 1) f32.
    """
    o_ref[...] = jnp.maximum(x_ref[...] * scale_ref[...] + shift_ref[...], 0.0)


# ------------------------------ Pallas wrappers -----------------------------

def _conv_with_stats(a_t, w_t, tm):
    Kp, Mp = a_t.shape
    Co = w_t.shape[0]
    assert Mp % tm == 0
    nt = Mp // tm
    return pl.pallas_call(
        _conv_mm_stats_kernel,
        out_shape=(jax.ShapeDtypeStruct((Co, Mp), jnp.float32),
                   jax.ShapeDtypeStruct((nt, Co, 1), jnp.float32),
                   jax.ShapeDtypeStruct((nt, Co, 1), jnp.float32)),
        grid=(nt,),
        in_specs=[pl.BlockSpec((Kp, tm), lambda i: (0, i)),
                  pl.BlockSpec((Co, Kp), lambda i: (0, 0))],
        out_specs=(pl.BlockSpec((Co, tm), lambda i: (0, i)),
                   pl.BlockSpec((1, Co, 1), lambda i: (i, 0, 0)),
                   pl.BlockSpec((1, Co, 1), lambda i: (i, 0, 0))),
        compiler_params=pltpu.CompilerParams(
            dimension_semantics=("parallel",),
            vmem_limit_bytes=_VMEM_LIMIT),
    )(a_t, w_t)


def _bn_relu(y, scale_col, shift_col, tm):
    Co, Mp = y.shape
    assert Mp % tm == 0
    nt = Mp // tm
    return pl.pallas_call(
        _bn_relu_kernel,
        out_shape=jax.ShapeDtypeStruct((Co, Mp), jnp.float32),
        grid=(nt,),
        in_specs=[pl.BlockSpec((Co, tm), lambda i: (0, i)),
                  pl.BlockSpec((Co, 1), lambda i: (0, 0)),
                  pl.BlockSpec((Co, 1), lambda i: (0, 0))],
        out_specs=pl.BlockSpec((Co, tm), lambda i: (0, i)),
        input_output_aliases={0: 0},   # reuse y's HBM buffer for the output
        compiler_params=pltpu.CompilerParams(
            dimension_semantics=("parallel",),
            vmem_limit_bytes=_VMEM_LIMIT),
    )(y, scale_col, shift_col)


# --------------------------------- JAX glue ---------------------------------

def _round_up(x, m):
    return (x + m - 1) // m * m


def _pick_tm(M, Kp, Co, budget_bytes=32 * 1024 * 1024):
    """Largest tile in {512, 256, 128} whose double-buffered footprint fits."""
    tm = 512
    while tm > 128:
        need = 2 * Kp * tm * 2 + 2 * Co * Kp * 2 + 2 * Co * tm * 4
        if need <= budget_bytes:
            break
        tm //= 2
    if M < tm:
        tm = max(128, _round_up(M, 128))
    return tm


def _im2col_t_3x3x3(x_cn, Kp, Mp):
    """Transposed 3x3x3 'same' im2col: (C,N,D,H,W) -> (Kp, Mp) bf16.

    Row index = tap*C + c  with tap = (kd*3 + kh)*3 + kw, matching the weight
    matrix layout below. K and M are zero-padded (zero rows/cols are exact
    no-ops for the bias-free matmul and for the sum/sumsq statistics).
    """
    C, N, D, H, W = x_cn.shape
    M = N * D * H * W
    K = 27 * C
    xp = jnp.pad(x_cn.astype(jnp.bfloat16),
                 ((0, 0), (0, 0), (1, 1), (1, 1), (1, 1)))
    taps = []
    for kd in range(3):
        for kh in range(3):
            for kw in range(3):
                taps.append(xp[:, :, kd:kd + D, kh:kh + H, kw:kw + W]
                            .reshape(C, M))
    a_t = jnp.concatenate(taps, axis=0)                     # (27*C, M)
    a_t = jnp.pad(a_t, ((0, Kp - K), (0, Mp - M)))
    return a_t


def _conv3d_bn_relu_cfirst(x_cn, w_torch, gamma, beta, eps=1e-5):
    """Conv3d(3x3x3, pad 1) + BatchNorm3d (train-mode stats) + ReLU.

    x_cn : (Ci, N, D, H, W) float32 ; w_torch : (Co, Ci, 3, 3, 3)
    returns (Co, N, D, H, W) float32.
    Conv bias is intentionally omitted: it cancels exactly under train-mode BN.
    """
    Ci, N, D, H, W = x_cn.shape
    Co = w_torch.shape[0]
    M = N * D * H * W
    K = 27 * Ci
    Kp = _round_up(K, 128)
    tm = _pick_tm(M, Kp, Co)
    Mp = _round_up(M, tm)

    a_t = _im2col_t_3x3x3(x_cn, Kp, Mp)                     # (Kp, Mp) bf16

    # torch weight (Co,Ci,kd,kh,kw) -> (Co, kd,kh,kw, Ci) -> (Co, 27*Ci) -> pad K
    w_t = jnp.transpose(w_torch, (0, 2, 3, 4, 1)).reshape(Co, K)
    w_t = jnp.pad(w_t, ((0, 0), (0, Kp - K))).astype(jnp.bfloat16)

    y, ps, pss = _conv_with_stats(a_t, w_t, tm)             # y: (Co, Mp) f32

    s = jnp.sum(ps, axis=0)                                 # (Co, 1)
    ss = jnp.sum(pss, axis=0)                               # (Co, 1)
    mean = s / M
    var = jnp.maximum(ss / M - mean * mean, 0.0)            # biased var, clamped
    scale = gamma.reshape(Co, 1) * lax.rsqrt(var + eps)
    shift = beta.reshape(Co, 1) - mean * scale

    out = _bn_relu(y, scale, shift, tm)                     # (Co, Mp)
    return out[:, :M].reshape(Co, N, D, H, W)


def _interp_matrix_align_corners_x2(in_size):
    """(2*S, S) linear-interp matrix (scale 2, align_corners=True)."""
    out_size = 2 * in_size
    A = np.zeros((out_size, in_size), dtype=np.float32)
    if in_size == 1:
        A[:, 0] = 1.0
        return jnp.asarray(A)
    for i in range(out_size):
        pos = i * (in_size - 1) / (out_size - 1)
        i0 = int(np.floor(pos))
        i1 = min(i0 + 1, in_size - 1)
        f = pos - i0
        A[i, i0] += 1.0 - f
        A[i, i1] += f
    return jnp.asarray(A)


def unet_up3_ct_forward(inputs1, inputs2, params):
    """UnetUp3_CT forward.

    inputs1 : (N, out_size, D1, H1, W1)  skip connection (NCDHW)
    inputs2 : (N, in_size,  D2, H2, W2)  to be upsampled  (NCDHW)
    returns : (N, out_size, 2*D2, 2*H2, 2*W2)             (NCDHW)
    """
    # Channel-first "CNDHW" internal layout: only the two leading (major) dims
    # swap vs NCDHW, so no minor-dim relayout is needed anywhere.
    x1 = jnp.transpose(inputs1, (1, 0, 2, 3, 4))
    x2 = jnp.transpose(inputs2, (1, 0, 2, 3, 4))

    _, _, D2, H2, W2 = x2.shape
    Ad = _interp_matrix_align_corners_x2(D2)
    Ah = _interp_matrix_align_corners_x2(H2)
    Aw = _interp_matrix_align_corners_x2(W2)
    # nn.Upsample(scale_factor=(2,2,2), mode='trilinear', align_corners=True)
    up2 = jnp.einsum('cndhw,Dd,Hh,Ww->cnDHW', x2, Ad, Ah, Aw)

    # F.pad with padding = [o, o, 0, o, o, 0]  ->  W:(o,o), H:(0,o), D:(o,0)
    offset = up2.shape[2] - x1.shape[2]
    o = offset // 2
    x1p = jnp.pad(x1, ((0, 0), (0, 0), (o, 0), (0, o), (o, o)))

    x = jnp.concatenate([x1p, up2], axis=0)                 # concat on channels

    h = _conv3d_bn_relu_cfirst(x, params['w1'], params['g1'], params['be1'])
    h = _conv3d_bn_relu_cfirst(h, params['w2'], params['g2'], params['be2'])

    return jnp.transpose(h, (1, 0, 2, 3, 4))                # back to NCDHW


# ----------------------------------- main -----------------------------------

if __name__ == "__main__":
    key = jax.random.PRNGKey(0)
    in_size, out_size = 8, 4          # inputs2 channels / inputs1 & output channels
    N, D, H, W = 2, 4, 4, 4           # inputs2 spatial; inputs1 is 2x in each dim

    ks = jax.random.split(key, 10)
    inputs1 = jax.random.normal(ks[0], (N, out_size, 2 * D, 2 * H, 2 * W), jnp.float32)
    inputs2 = jax.random.normal(ks[1], (N, in_size, D, H, W), jnp.float32)

    # Conv3d weight layout follows PyTorch: (Cout, Cin, kD, kH, kW).
    # b1/b2 kept for parameter parity with the module but intentionally unused:
    # a conv bias preceding train-mode BatchNorm cancels exactly.
    params = dict(
        w1=0.1 * jax.random.normal(ks[2], (out_size, in_size + out_size, 3, 3, 3), jnp.float32),
        b1=0.1 * jax.random.normal(ks[3], (out_size,), jnp.float32),
        g1=1.0 + 0.1 * jax.random.normal(ks[4], (out_size,), jnp.float32),
        be1=0.1 * jax.random.normal(ks[5], (out_size,), jnp.float32),
        w2=0.1 * jax.random.normal(ks[6], (out_size, out_size, 3, 3, 3), jnp.float32),
        b2=0.1 * jax.random.normal(ks[7], (out_size,), jnp.float32),
        g2=1.0 + 0.1 * jax.random.normal(ks[8], (out_size,), jnp.float32),
        be2=0.1 * jax.random.normal(ks[9], (out_size,), jnp.float32),
    )

    out = jax.jit(unet_up3_ct_forward)(inputs1, inputs2, params)
    out = jax.block_until_ready(out)
    assert out.shape == (N, out_size, 2 * D, 2 * H, 2 * W), out.shape
    assert jnp.all(jnp.isfinite(out))
    print("KERNEL_OK")
</pallas_src>

<mosaic_0001>
module attributes {stable_mosaic.version = 11 : i64} {
  func.func @_conv_mm_stats_kernel(%arg0: i32, %arg1: memref<384x512xbf16, #tpu.memory_space<vmem>>, %arg2: memref<4x384xbf16, #tpu.memory_space<vmem>>, %arg3: memref<4x512xf32, #tpu.memory_space<vmem>>, %arg4: memref<1x4x1xf32, #tpu.memory_space<vmem>>, %arg5: memref<1x4x1xf32, #tpu.memory_space<vmem>>) attributes {dimension_semantics = [#tpu.dimension_semantics<parallel>], iteration_bounds = array<i64: 2>, scalar_prefetch = 0 : i64, scratch_operands = 0 : i64, tpu.core_type = #tpu.core_type<tc>, window_params = [{transform_indices = @transform_0, window_bounds = array<i64: 384, 512>}, {pipeline_mode = #tpu.pipeline_mode<synchronous>, transform_indices = @transform_1, window_bounds = array<i64: 4, 384>}, {transform_indices = @transform_2, window_bounds = array<i64: 4, 512>}, {transform_indices = @transform_3, window_bounds = array<i64: 1, 4, 1>}, {transform_indices = @transform_4, window_bounds = array<i64: 1, 4, 1>}]} {
    %c0 = arith.constant 0 : index
    %c0_0 = arith.constant 0 : index
    %0 = vector.load %arg2[%c0, %c0_0] : memref<4x384xbf16, #tpu.memory_space<vmem>>, vector<4x384xbf16>
    %c0_1 = arith.constant 0 : index
    %c0_2 = arith.constant 0 : index
    %1 = vector.load %arg1[%c0_1, %c0_2] : memref<384x512xbf16, #tpu.memory_space<vmem>>, vector<384x512xbf16>
    %cst = arith.constant dense<0.000000e+00> : vector<4x512xf32>
    %2 = tpu.matmul %0, %1, %cst {dimension_numbers = #tpu.dot_dimension_numbers<[1], [0], [0], [1], [0, 0, 1, 1], [], []>} : vector<4x384xbf16>, vector<384x512xbf16>, vector<4x512xf32> -> vector<4x512xf32>
    %c0_3 = arith.constant 0 : index
    %c0_4 = arith.constant 0 : index
    %3 = vector.load %arg3[%c0_3, %c0_4] : memref<4x512xf32, #tpu.memory_space<vmem>>, vector<4x512xf32>
    tpu.vector_store %arg3[%c0_3, %c0_4], %2 {strides = array<i32>} : memref<4x512xf32, #tpu.memory_space<vmem>>, vector<4x512xf32>,
    %cst_5 = arith.constant dense<0.000000e+00> : vector<4xf32>
    %4 = vector.multi_reduction <add>, %2, %cst_5 [1] : vector<4x512xf32> to vector<4xf32>
    %5 = vector.shape_cast %4 : vector<4xf32> to vector<4x1xf32>
    %6 = vector.shape_cast %5 : vector<4x1xf32> to vector<1x4x1xf32>
    %c0_6 = arith.constant 0 : index
    %c0_7 = arith.constant 0 : index
    %c0_8 = arith.constant 0 : index
    %7 = vector.load %arg4[%c0_6, %c0_7, %c0_8] : memref<1x4x1xf32, #tpu.memory_space<vmem>>, vector<1x4x1xf32>
    tpu.vector_store %arg4[%c0_6, %c0_7, %c0_8], %6 {strides = array<i32>} : memref<1x4x1xf32, #tpu.memory_space<vmem>>, vector<1x4x1xf32>,
    %8 = arith.mulf %2, %2 : vector<4x512xf32>
    %cst_9 = arith.constant dense<0.000000e+00> : vector<4xf32>
    %9 = vector.multi_reduction <add>, %8, %cst_9 [1] : vector<4x512xf32> to vector<4xf32>
    %10 = vector.shape_cast %9 : vector<4xf32> to vector<4x1xf32>
    %11 = vector.shape_cast %10 : vector<4x1xf32> to vector<1x4x1xf32>
    %c0_10 = arith.constant 0 : index
    %c0_11 = arith.constant 0 : index
    %c0_12 = arith.constant 0 : index
    %12 = vector.load %arg5[%c0_10, %c0_11, %c0_12] : memref<1x4x1xf32, #tpu.memory_space<vmem>>, vector<1x4x1xf32>
    tpu.vector_store %arg5[%c0_10, %c0_11, %c0_12], %11 {strides = array<i32>} : memref<1x4x1xf32, #tpu.memory_space<vmem>>, vector<1x4x1xf32>,
    return
  }
  func.func @transform_0(%arg0: i32) -> (i32, i32) {
    %c0_i32 = arith.constant 0 : i32
    %c0_i32_0 = arith.constant 0 : i32
    return %c0_i32, %arg0 : i32, i32
  }
  func.func @transform_1(%arg0: i32) -> (i32, i32) {
    %c0_i32 = arith.constant 0 : i32
    %c0_i32_0 = arith.constant 0 : i32
    %c0_i32_1 = arith.constant 0 : i32
    return %c0_i32, %c0_i32_0 : i32, i32
  }
  func.func @transform_2(%arg0: i32) -> (i32, i32) {
    %c0_i32 = arith.constant 0 : i32
    %c0_i32_0 = arith.constant 0 : i32
    return %c0_i32, %arg0 : i32, i32
  }
  func.func @transform_3(%arg0: i32) -> (i32, i32, i32) {
    %c0_i32 = arith.constant 0 : i32
    %c0_i32_0 = arith.constant 0 : i32
    %c0_i32_1 = arith.constant 0 : i32
    return %arg0, %c0_i32, %c0_i32_0 : i32, i32, i32
  }
  func.func @transform_4(%arg0: i32) -> (i32, i32, i32) {
    %c0_i32 = arith.constant 0 : i32
    %c0_i32_0 = arith.constant 0 : i32
    %c0_i32_1 = arith.constant 0 : i32
    return %arg0, %c0_i32, %c0_i32_0 : i32, i32, i32
  }
}

module attributes {stable_mosaic.version = 11 : i64} {
  func.func @_bn_relu_kernel(%arg0: i32, %arg1: memref<4x512xf32, #tpu.memory_space<vmem>>, %arg2: memref<4x1xf32, #tpu.memory_space<vmem>>, %arg3: memref<4x1xf32, #tpu.memory_space<vmem>>, %arg4: memref<4x512xf32, #tpu.memory_space<vmem>>) attributes {dimension_semantics = [#tpu.dimension_semantics<parallel>], iteration_bounds = array<i64: 2>, scalar_prefetch = 0 : i64, scratch_operands = 0 : i64, tpu.core_type = #tpu.core_type<tc>, window_params = [{transform_indices = @transform_0, window_bounds = array<i64: 4, 512>}, {pipeline_mode = #tpu.pipeline_mode<synchronous>, transform_indices = @transform_1, window_bounds = array<i64: 4, 1>}, {pipeline_mode = #tpu.pipeline_mode<synchronous>, transform_indices = @transform_2, window_bounds = array<i64: 4, 1>}, {transform_indices = @transform_3, window_bounds = array<i64: 4, 512>}]} {
    %c0 = arith.constant 0 : index
    %c0_0 = arith.constant 0 : index
    %0 = vector.load %arg1[%c0, %c0_0] : memref<4x512xf32, #tpu.memory_space<vmem>>, vector<4x512xf32>
    %c0_1 = arith.constant 0 : index
    %c0_2 = arith.constant 0 : index
    %1 = vector.load %arg2[%c0_1, %c0_2] : memref<4x1xf32, #tpu.memory_space<vmem>>, vector<4x1xf32>
    %2 = vector.broadcast %1 : vector<4x1xf32> to vector<4x512xf32>
    %3 = arith.mulf %0, %2 : vector<4x512xf32>
    %c0_3 = arith.constant 0 : index
    %c0_4 = arith.constant 0 : index
    %4 = vector.load %arg3[%c0_3, %c0_4] : memref<4x1xf32, #tpu.memory_space<vmem>>, vector<4x1xf32>
    %5 = vector.broadcast %4 : vector<4x1xf32> to vector<4x512xf32>
    %6 = arith.addf %3, %5 : vector<4x512xf32>
    %cst = arith.constant 0.000000e+00 : f32
    %7 = vector.broadcast %cst : f32 to vector<4x512xf32>
    %8 = arith.maximumf %6, %7 : vector<4x512xf32>
    %c0_5 = arith.constant 0 : index
    %c0_6 = arith.constant 0 : index
    %9 = vector.load %arg4[%c0_5, %c0_6] : memref<4x512xf32, #tpu.memory_space<vmem>>, vector<4x512xf32>
    tpu.vector_store %arg4[%c0_5, %c0_6], %8 {strides = array<i32>} : memref<4x512xf32, #tpu.memory_space<vmem>>, vector<4x512xf32>,
    return
  }
  func.func @transform_0(%arg0: i32) -> (i32, i32) {
    %c0_i32 = arith.constant 0 : i32
    %c0_i32_0 = arith.constant 0 : i32
    return %c0_i32, %arg0 : i32, i32
  }
  func.func @transform_1(%arg0: i32) -> (i32, i32) {
    %c0_i32 = arith.constant 0 : i32
    %c0_i32_0 = arith.constant 0 : i32
    %c0_i32_1 = arith.constant 0 : i32
    return %c0_i32, %c0_i32_0 : i32, i32
  }
  func.func @transform_2(%arg0: i32) -> (i32, i32) {
    %c0_i32 = arith.constant 0 : i32
    %c0_i32_0 = arith.constant 0 : i32
    %c0_i32_1 = arith.constant 0 : i32
    return %c0_i32, %c0_i32_0 : i32, i32
  }
  func.func @transform_3(%arg0: i32) -> (i32, i32) {
    %c0_i32 = arith.constant 0 : i32
    %c0_i32_0 = arith.constant 0 : i32
    return %c0_i32, %arg0 : i32, i32
  }
}

module attributes {stable_mosaic.version = 11 : i64} {
  func.func @_conv_mm_stats_kernel(%arg0: i32, %arg1: memref<128x512xbf16, #tpu.memory_space<vmem>>, %arg2: memref<4x128xbf16, #tpu.memory_space<vmem>>, %arg3: memref<4x512xf32, #tpu.memory_space<vmem>>, %arg4: memref<1x4x1xf32, #tpu.memory_space<vmem>>, %arg5: memref<1x4x1xf32, #tpu.memory_space<vmem>>) attributes {dimension_semantics = [#tpu.dimension_semantics<parallel>], iteration_bounds = array<i64: 2>, scalar_prefetch = 0 : i64, scratch_operands = 0 : i64, tpu.core_type = #tpu.core_type<tc>, window_params = [{transform_indices = @transform_0, window_bounds = array<i64: 128, 512>}, {pipeline_mode = #tpu.pipeline_mode<synchronous>, transform_indices = @transform_1, window_bounds = array<i64: 4, 128>}, {transform_indices = @transform_2, window_bounds = array<i64: 4, 512>}, {transform_indices = @transform_3, window_bounds = array<i64: 1, 4, 1>}, {transform_indices = @transform_4, window_bounds = array<i64: 1, 4, 1>}]} {
    %c0 = arith.constant 0 : index
    %c0_0 = arith.constant 0 : index
    %0 = vector.load %arg2[%c0, %c0_0] : memref<4x128xbf16, #tpu.memory_space<vmem>>, vector<4x128xbf16>
    %c0_1 = arith.constant 0 : index
    %c0_2 = arith.constant 0 : index
    %1 = vector.load %arg1[%c0_1, %c0_2] : memref<128x512xbf16, #tpu.memory_space<vmem>>, vector<128x512xbf16>
    %cst = arith.constant dense<0.000000e+00> : vector<4x512xf32>
    %2 = tpu.matmul %0, %1, %cst {dimension_numbers = #tpu.dot_dimension_numbers<[1], [0], [0], [1], [0, 0, 1, 1], [], []>} : vector<4x128xbf16>, vector<128x512xbf16>, vector<4x512xf32> -> vector<4x512xf32>
    %c0_3 = arith.constant 0 : index
    %c0_4 = arith.constant 0 : index
    %3 = vector.load %arg3[%c0_3, %c0_4] : memref<4x512xf32, #tpu.memory_space<vmem>>, vector<4x512xf32>
    tpu.vector_store %arg3[%c0_3, %c0_4], %2 {strides = array<i32>} : memref<4x512xf32, #tpu.memory_space<vmem>>, vector<4x512xf32>,
    %cst_5 = arith.constant dense<0.000000e+00> : vector<4xf32>
    %4 = vector.multi_reduction <add>, %2, %cst_5 [1] : vector<4x512xf32> to vector<4xf32>
    %5 = vector.shape_cast %4 : vector<4xf32> to vector<4x1xf32>
    %6 = vector.shape_cast %5 : vector<4x1xf32> to vector<1x4x1xf32>
    %c0_6 = arith.constant 0 : index
    %c0_7 = arith.constant 0 : index
    %c0_8 = arith.constant 0 : index
    %7 = vector.load %arg4[%c0_6, %c0_7, %c0_8] : memref<1x4x1xf32, #tpu.memory_space<vmem>>, vector<1x4x1xf32>
    tpu.vector_store %arg4[%c0_6, %c0_7, %c0_8], %6 {strides = array<i32>} : memref<1x4x1xf32, #tpu.memory_space<vmem>>, vector<1x4x1xf32>,
    %8 = arith.mulf %2, %2 : vector<4x512xf32>
    %cst_9 = arith.constant dense<0.000000e+00> : vector<4xf32>
    %9 = vector.multi_reduction <add>, %8, %cst_9 [1] : vector<4x512xf32> to vector<4xf32>
    %10 = vector.shape_cast %9 : vector<4xf32> to vector<4x1xf32>
    %11 = vector.shape_cast %10 : vector<4x1xf32> to vector<1x4x1xf32>
    %c0_10 = arith.constant 0 : index
    %c0_11 = arith.constant 0 : index
    %c0_12 = arith.constant 0 : index
    %12 = vector.load %arg5[%c0_10, %c0_11, %c0_12] : memref<1x4x1xf32, #tpu.memory_space<vmem>>, vector<1x4x1xf32>
    tpu.vector_store %arg5[%c0_10, %c0_11, %c0_12], %11 {strides = array<i32>} : memref<1x4x1xf32, #tpu.memory_space<vmem>>, vector<1x4x1xf32>,
    return
  }
  func.func @transform_0(%arg0: i32) -> (i32, i32) {
    %c0_i32 = arith.constant 0 : i32
    %c0_i32_0 = arith.constant 0 : i32
    return %c0_i32, %arg0 : i32, i32
  }
  func.func @transform_1(%arg0: i32) -> (i32, i32) {
    %c0_i32 = arith.constant 0 : i32
    %c0_i32_0 = arith.constant 0 : i32
    %c0_i32_1 = arith.constant 0 : i32
    return %c0_i32, %c0_i32_0 : i32, i32
  }
  func.func @transform_2(%arg0: i32) -> (i32, i32) {
    %c0_i32 = arith.constant 0 : i32
    %c0_i32_0 = arith.constant 0 : i32
    return %c0_i32, %arg0 : i32, i32
  }
  func.func @transform_3(%arg0: i32) -> (i32, i32, i32) {
    %c0_i32 = arith.constant 0 : i32
    %c0_i32_0 = arith.constant 0 : i32
    %c0_i32_1 = arith.constant 0 : i32
    return %arg0, %c0_i32, %c0_i32_0 : i32, i32, i32
  }
  func.func @transform_4(%arg0: i32) -> (i32, i32, i32) {
    %c0_i32 = arith.constant 0 : i32
    %c0_i32_0 = arith.constant 0 : i32
    %c0_i32_1 = arith.constant 0 : i32
    return %arg0, %c0_i32, %c0_i32_0 : i32, i32, i32
  }
}

</mosaic_0001>

<bundles_post_ra>
// kernel: unet_up3_ct_forward.5
= control target key start
LH: loop header
LB: loop body
LE: loop exit
PB: predicated region body
PF: predicated region fallthrough
CT: control target
= control target key end

     0   :  { %s312_s12 = smov 0   ;;  %s335_s0 = inlined_call_operand.vmem [shape: f32[4,1024], index: 0, kind: input, shape index: {}, may-alias: {0,3}]   ;;  %s336_s1 = inlined_call_operand.vmem [shape: f32[4,1], index: 1, kind: input, shape index: {}]   ;;  %s337_s2 = inlined_call_operand.vmem [shape: f32[4,1], index: 2, kind: input, shape index: {}]   ;;  %s338_s3 = inlined_call_operand.vmem [shape: f32[4,1024], index: 3, kind: output, shape index: {}, may-alias: {0,3}]  }
   0x1 LB: > { %s260_s13 = sadd.s32 4294967295, %s288_s12   ;;  %p264_p0 = scmp.ge.s32.totalorder %s288_s12, 1  ;;  %s288_s12 = sphi %s312_s12, %s13_s12  }
   0x2   : > { %p138_p1 = scmp.lt.s32.totalorder %s288_s12, 3 }
   0x4   : > { %p139_p2 = pnand %p264_p0, %p138_p1 }
   0x5   : > { %s265_s18 = sshll.u32 (!%p139_p2), %s260_s13, 2 }
   0x6   : > { %142 = sbr.rel (%p139_p2) target bundleno = 144 (0x90), region = 32  ;;  %p163_p3 = scmp.lt.s32.totalorder (!%p139_p2), %s265_s18, 7 }
   0xb   : > { %v176_v0 = vld [vmem:[%s336_s1] sm:$0xf]  ;;  %v290_v1 = vmov 0   ;;  %s340_s18 = smov (!%p163_p3, %s265_s18), 7  ;;  %v291_v3 = vmov 839922192  }
   0xc   : > { %281 = vset.pattern.permute.xlu0 %v290_v1  ;;  %v188_v2 = vld [vmem:[%s337_s2] sm:$0xf]  ;;  %v182_v4 = vunpack.c.l.s4 %v291_v3  ;;  %s266_s19 = sshll.u32 %s340_s18, 2 }
   0xd   : > { %179 = vperm.xlu0 %281, %v176_v0   ;;  %s166_s22 = scalar_lea.vmem %s335_s0, %s266_s19  ;;  %s172_s25 = scalar_lea.vmem %s338_s3, %s266_s19 }
   0xe   : > { %v183_v6 = vunpack.c.0.s8 %v182_v4  ;;  %v174_v8 = vld [vmem:[%s166_s22] sm:$0xff]  ;;  %v175_v9 = vld [vmem:[%s166_s22 + $0x8] sm:$0xff] }
  0x15   : > { %191 = vperm.xlu0 %281, %v188_v2  }
  0x7f   : > { %v180_v5 = vpop.permute.xlu0 %179 }
  0x80   : > { %v184_v7 = vperm.slane %v180_v5, %v183_v6 }
  0x82   : > { %v186_v11 = vmul.f32 %v184_v7, %v174_v8  ;;  %v187_v12 = vmul.f32 %v184_v7, %v175_v9 }
  0x87   : > { %v192_v10 = vpop.permute.xlu0 %191 }
  0x88   : > { %v196_v13 = vperm.slane %v192_v10, %v183_v6 }
  0x8a   : > { %v198_v14 = vadd.f32 %v196_v13, %v186_v11  ;;  %v199_v15 = vadd.f32 %v196_v13, %v187_v12 }
  0x8c   : > { %v200_v16 = vmax.f32 %v198_v14, 0.0  ;;  %v201_v17 = vmax.f32 %v199_v15, 0.0 }
  0x8e   : > { %202 = vst [vmem:[%s172_s25] sm:$0xff] %v200_v16 }
  0x8f   : > { %203 = vst [vmem:[%s172_s25 + $0x8] sm:$0xff] %v201_v17 }
  0x90 PF: > { %s13_s12 = sadd.s32 1, %s288_s12  }
  0x91   : > { %p10_p4 = scmp.ge.s32.totalorder %s13_s12, 4  }
  0x93   :  { %12 = sbr.rel (!%p10_p4) target bundleno = 1 (0x1), region = 62 }

// kernel: unet_up3_ct_forward.4
= control target key start
LH: loop header
LB: loop body
LE: loop exit
PB: predicated region body
PF: predicated region fallthrough
CT: control target
= control target key end

     0   :  { %s1903_s15 = smov 0   ;;  %s1905_s16 = smov 0   ;;  %s2389_s0 = inlined_call_operand.vmem [shape: bf16[384,1024], index: 0, kind: input, shape index: {}]   ;;  %s2390_s1 = inlined_call_operand.vmem [shape: bf16[4,384], index: 1, kind: input, shape index: {}]   ;;  %s2391_s2 = inlined_call_operand.vmem [shape: f32[4,1024], index: 2, kind: output, shape index: {0}]   ;;  %s2392_s3 = inlined_call_operand.vmem [shape: f32[2,4,1], index: 3, kind: output, shape index: {1}]   ;;  %s2393_s4 = inlined_call_operand.vmem [shape: f32[2,4,1], index: 4, kind: output, shape index: {2}]  }
   0x1   :  { %s1907_s17 = smov 0  }
   0x2 LB: > { %s1919_s18 = sadd.s32 4294967295, %s1876_s17   ;;  %s1922_s19 = sadd.s32 1, %s1876_s17   ;;  %s1876_s17 = sphi %s1907_s17, %s2396_s17   ;;  %s1872_s16 = sphi %s1905_s16, %s2395_s16   ;;  %s1868_s15 = sphi %s1903_s15, %s2394_s15  }
   0x3   : > { %s19_s20 = ssub.s32 %s1876_s17, %s1922_s19  ;;  %s22_s21 = sadd.s32 1, %s1872_s16 }
   0x4   : > { %p20_p0 = scmp.eq.s32.totalorder %s19_s20, 0  ;;  %p29_p1 = scmp.ne.s32.totalorder %s1872_s16, %s1868_s15 }
   0x5   : > { %p30_p2 = scmp.eq.s32.totalorder %s1876_s17, 0  ;;  %p1337_p4 = scmp.ge.s32.totalorder %s1876_s17, 2 }
   0x6   : > { %s1931_s22 = scalar_select %p20_p0, %s1872_s16, %s22_s21  }
   0x7   : > { %p31_p3 = por %p30_p2, %p29_p1  ;;  %157 = sbr.rel (%p1337_p4) target bundleno = 112 (0x70), region = 20 }
   0xc   : > { %160 = sbr.rel (!%p31_p3) target bundleno = 112 (0x70), region = 24  ;;  %s162_s23 = sand.u32 (%p31_p3), 1, %s1872_s16  }
   0xd   : > { %s1731_s24 = sshll.u32 (%p31_p3), %s1876_s17, 4  ;;  %s1828_s25 = smul.u32 (%p31_p3), 768, %s162_s23 }
   0xe   : > { %s1939_s28 = scalar_lea.vmem (%p31_p3), %s2389_s0, %s1731_s24 }
   0xf   : > { %v180_v0 = vld [vmem:[%s1939_s28] sm:$0xff] (%p31_p3)  ;;  %v182_v1 = vld [vmem:[%s1939_s28 + $0x8] sm:$0xff] (%p31_p3)  ;;  %s1944_s29 = scalar_lea.vmem (%p31_p3), [#allocation2], %s1828_s25 }
  0x10   : > { %v184_v2 = vld [vmem:[%s1939_s28 + $0x20] sm:$0xff] (%p31_p3)  ;;  %181 = vst [vmem:[%s1944_s29] sm:$0xff] (%p31_p3), %v180_v0  ;;  %v186_v3 = vld [vmem:[%s1939_s28 + $0x28] sm:$0xff] (%p31_p3) }
  0x11   : > { %183 = vst [vmem:[%s1944_s29 + $0x8] sm:$0xff] %v182_v1  ;;  %v188_v4 = vld [vmem:[%s1939_s28 + $0x40] sm:$0xff]  ;;  %v190_v5 = vld [vmem:[%s1939_s28 + $0x48] sm:$0xff] }
  0x12   : > { %185 = vst [vmem:[%s1944_s29 + $0x10] sm:$0xff] %v184_v2  ;;  %v192_v6 = vld [vmem:[%s1939_s28 + $0x60] sm:$0xff]  ;;  %v194_v7 = vld [vmem:[%s1939_s28 + $0x68] sm:$0xff] }
  0x13   : > { %187 = vst [vmem:[%s1944_s29 + $0x18] sm:$0xff] %v186_v3  ;;  %v196_v8 = vld [vmem:[%s1939_s28 + $0x80] sm:$0xff]  ;;  %v198_v9 = vld [vmem:[%s1939_s28 + $0x88] sm:$0xff] }
  0x14   : > { %189 = vst [vmem:[%s1944_s29 + $0x20] sm:$0xff] %v188_v4  ;;  %v200_v10 = vld [vmem:[%s1939_s28 + $0xa0] sm:$0xff]  ;;  %v202_v11 = vld [vmem:[%s1939_s28 + $0xa8] sm:$0xff] }
  0x15   : > { %191 = vst [vmem:[%s1944_s29 + $0x28] sm:$0xff] %v190_v5  ;;  %v204_v12 = vld [vmem:[%s1939_s28 + $0xc0] sm:$0xff]  ;;  %v206_v13 = vld [vmem:[%s1939_s28 + $0xc8] sm:$0xff] }
  0x16   : > { %193 = vst [vmem:[%s1944_s29 + $0x30] sm:$0xff] %v192_v6  ;;  %v208_v14 = vld [vmem:[%s1939_s28 + $0xe0] sm:$0xff]  ;;  %v210_v15 = vld [vmem:[%s1939_s28 + $0xe8] sm:$0xff] }
  0x17   : > { %195 = vst [vmem:[%s1944_s29 + $0x38] sm:$0xff] %v194_v7  ;;  %v212_v16 = vld [vmem:[%s1939_s28 + $0x100] sm:$0xff]  ;;  %v214_v17 = vld [vmem:[%s1939_s28 + $0x108] sm:$0xff] }
  0x18   : > { %197 = vst [vmem:[%s1944_s29 + $0x40] sm:$0xff] %v196_v8  ;;  %v216_v18 = vld [vmem:[%s1939_s28 + $0x120] sm:$0xff]  ;;  %v218_v19 = vld [vmem:[%s1939_s28 + $0x128] sm:$0xff] }
  0x19   : > { %199 = vst [vmem:[%s1944_s29 + $0x48] sm:$0xff] %v198_v9  ;;  %v220_v20 = vld [vmem:[%s1939_s28 + $0x140] sm:$0xff]  ;;  %v222_v21 = vld [vmem:[%s1939_s28 + $0x148] sm:$0xff] }
  0x1a   : > { %201 = vst [vmem:[%s1944_s29 + $0x50] sm:$0xff] %v200_v10  ;;  %v224_v22 = vld [vmem:[%s1939_s28 + $0x160] sm:$0xff]  ;;  %v226_v23 = vld [vmem:[%s1939_s28 + $0x168] sm:$0xff] }
  0x1b   : > { %203 = vst [vmem:[%s1944_s29 + $0x58] sm:$0xff] %v202_v11  ;;  %v228_v24 = vld [vmem:[%s1939_s28 + $0x180] sm:$0xff]  ;;  %v230_v25 = vld [vmem:[%s1939_s28 + $0x188] sm:$0xff] }
  0x1c   : > { %205 = vst [vmem:[%s1944_s29 + $0x60] sm:$0xff] %v204_v12  ;;  %v232_v26 = vld [vmem:[%s1939_s28 + $0x1a0] sm:$0xff]  ;;  %v234_v27 = vld [vmem:[%s1939_s28 + $0x1a8] sm:$0xff] }
  0x1d   : > { %207 = vst [vmem:[%s1944_s29 + $0x68] sm:$0xff] %v206_v13  ;;  %v236_v28 = vld [vmem:[%s1939_s28 + $0x1c0] sm:$0xff]  ;;  %v238_v29 = vld [vmem:[%s1939_s28 + $0x1c8] sm:$0xff] }
  0x1e   : > { %209 = vst [vmem:[%s1944_s29 + $0x70] sm:$0xff] %v208_v14  ;;  %v240_v30 = vld [vmem:[%s1939_s28 + $0x1e0] sm:$0xff]  ;;  %v242_v31 = vld [vmem:[%s1939_s28 + $0x1e8] sm:$0xff] }
  0x1f   : > { %211 = vst [vmem:[%s1944_s29 + $0x78] sm:$0xff] %v210_v15  ;;  %v244_v32 = vld [vmem:[%s1939_s28 + $0x200] sm:$0xff]  ;;  %v246_v33 = vld [vmem:[%s1939_s28 + $0x208] sm:$0xff] }
  0x20   : > { %213 = vst [vmem:[%s1944_s29 + $0x80] sm:$0xff] %v212_v16  ;;  %v248_v34 = vld [vmem:[%s1939_s28 + $0x220] sm:$0xff]  ;;  %v250_v35 = vld [vmem:[%s1939_s28 + $0x228] sm:$0xff] }
  0x21   : > { %215 = vst [vmem:[%s1944_s29 + $0x88] sm:$0xff] %v214_v17  ;;  %v252_v36 = vld [vmem:[%s1939_s28 + $0x240] sm:$0xff]  ;;  %v254_v37 = vld [vmem:[%s1939_s28 + $0x248] sm:$0xff] }
  0x22   : > { %217 = vst [vmem:[%s1944_s29 + $0x90] sm:$0xff] %v216_v18  ;;  %v256_v38 = vld [vmem:[%s1939_s28 + $0x260] sm:$0xff]  ;;  %v258_v39 = vld [vmem:[%s1939_s28 + $0x268] sm:$0xff] }
  0x23   : > { %219 = vst [vmem:[%s1944_s29 + $0x98] sm:$0xff] %v218_v19  ;;  %v260_v40 = vld [vmem:[%s1939_s28 + $0x280] sm:$0xff]  ;;  %v262_v41 = vld [vmem:[%s1939_s28 + $0x288] sm:$0xff] }
  0x24   : > { %221 = vst [vmem:[%s1944_s29 + $0xa0] sm:$0xff] %v220_v20  ;;  %v264_v42 = vld [vmem:[%s1939_s28 + $0x2a0] sm:$0xff]  ;;  %v266_v43 = vld [vmem:[%s1939_s28 + $0x2a8] sm:$0xff] }
  0x25   : > { %223 = vst [vmem:[%s1944_s29 + $0xa8] sm:$0xff] %v222_v21  ;;  %v268_v44 = vld [vmem:[%s1939_s28 + $0x2c0] sm:$0xff]  ;;  %v270_v45 = vld [vmem:[%s1939_s28 + $0x2c8] sm:$0xff] }
  0x26   : > { %225 = vst [vmem:[%s1944_s29 + $0xb0] sm:$0xff] %v224_v22  ;;  %v272_v46 = vld [vmem:[%s1939_s28 + $0x2e0] sm:$0xff]  ;;  %v274_v47 = vld [vmem:[%s1939_s28 + $0x2e8] sm:$0xff] }
  0x27   : > { %227 = vst [vmem:[%s1944_s29 + $0xb8] sm:$0xff] %v226_v23  ;;  %v276_v48 = vld [vmem:[%s1939_s28 + $0x300] sm:$0xff]  ;;  %v278_v49 = vld [vmem:[%s1939_s28 + $0x308] sm:$0xff] }
  0x28   : > { %229 = vst [vmem:[%s1944_s29 + $0xc0] sm:$0xff] %v228_v24  ;;  %v280_v50 = vld [vmem:[%s1939_s28 + $0x320] sm:$0xff]  ;;  %v282_v51 = vld [vmem:[%s1939_s28 + $0x328] sm:$0xff] }
  0x29   : > { %231 = vst [vmem:[%s1944_s29 + $0xc8] sm:$0xff] %v230_v25  ;;  %v284_v52 = vld [vmem:[%s1939_s28 + $0x340] sm:$0xff]  ;;  %v286_v53 = vld [vmem:[%s1939_s28 + $0x348] sm:$0xff] }
  0x2a   : > { %233 = vst [vmem:[%s1944_s29 + $0xd0] sm:$0xff] %v232_v26  ;;  %v288_v54 = vld [vmem:[%s1939_s28 + $0x360] sm:$0xff]  ;;  %v290_v55 = vld [vmem:[%s1939_s28 + $0x368] sm:$0xff] }
  0x2b   : > { %235 = vst [vmem:[%s1944_s29 + $0xd8] sm:$0xff] %v234_v27  ;;  %v292_v56 = vld [vmem:[%s1939_s28 + $0x380] sm:$0xff]  ;;  %v294_v57 = vld [vmem:[%s1939_s28 + $0x388] sm:$0xff] }
  0x2c   : > { %237 = vst [vmem:[%s1944_s29 + $0xe0] sm:$0xff] %v236_v28  ;;  %v296_v58 = vld [vmem:[%s1939_s28 + $0x3a0] sm:$0xff]  ;;  %v298_v59 = vld [vmem:[%s1939_s28 + $0x3a8] sm:$0xff] }
  0x2d   : > { %239 = vst [vmem:[%s1944_s29 + $0xe8] sm:$0xff] %v238_v29  ;;  %v300_v60 = vld [vmem:[%s1939_s28 + $0x3c0] sm:$0xff]  ;;  %v302_v61 = vld [vmem:[%s1939_s28 + $0x3c8] sm:$0xff] }
  0x2e   : > { %241 = vst [vmem:[%s1944_s29 + $0xf0] sm:$0xff] %v240_v30  ;;  %v304_v62 = vld [vmem:[%s1939_s28 + $0x3e0] sm:$0xff]  ;;  %v306_v63 = vld [vmem:[%s1939_s28 + $0x3e8] sm:$0xff] }
  0x2f   : > { %243 = vst [vmem:[%s1944_s29 + $0xf8] sm:$0xff] %v242_v31  ;;  %v308_v0 = vld [vmem:[%s1939_s28 + $0x400] sm:$0xff]  ;;  %v310_v1 = vld [vmem:[%s1939_s28 + $0x408] sm:$0xff] }
  0x30   : > { %245 = vst [vmem:[%s1944_s29 + $0x100] sm:$0xff] %v244_v32  ;;  %v312_v2 = vld [vmem:[%s1939_s28 + $0x420] sm:$0xff]  ;;  %v314_v3 = vld [vmem:[%s1939_s28 + $0x428] sm:$0xff] }
  0x31   : > { %247 = vst [vmem:[%s1944_s29 + $0x108] sm:$0xff] %v246_v33  ;;  %v316_v4 = vld [vmem:[%s1939_s28 + $0x440] sm:$0xff]  ;;  %v318_v5 = vld [vmem:[%s1939_s28 + $0x448] sm:$0xff] }
  0x32   : > { %249 = vst [vmem:[%s1944_s29 + $0x110] sm:$0xff] %v248_v34  ;;  %v320_v6 = vld [vmem:[%s1939_s28 + $0x460] sm:$0xff]  ;;  %v322_v7 = vld [vmem:[%s1939_s28 + $0x468] sm:$0xff] }
  0x33   : > { %251 = vst [vmem:[%s1944_s29 + $0x118] sm:$0xff] %v250_v35  ;;  %v324_v8 = vld [vmem:[%s1939_s28 + $0x480] sm:$0xff]  ;;  %v326_v9 = vld [vmem:[%s1939_s28 + $0x488] sm:$0xff] }
  0x34   : > { %253 = vst [vmem:[%s1944_s29 + $0x120] sm:$0xff] %v252_v36  ;;  %v328_v10 = vld [vmem:[%s1939_s28 + $0x4a0] sm:$0xff]  ;;  %v330_v11 = vld [vmem:[%s1939_s28 + $0x4a8] sm:$0xff] }
  0x35   : > { %255 = vst [vmem:[%s1944_s29 + $0x128] sm:$0xff] %v254_v37  ;;  %v332_v12 = vld [vmem:[%s1939_s28 + $0x4c0] sm:$0xff]  ;;  %v334_v13 = vld [vmem:[%s1939_s28 + $0x4c8] sm:$0xff] }
  0x36   : > { %257 = vst [vmem:[%s1944_s29 + $0x130] sm:$0xff] %v256_v38  ;;  %v336_v14 = vld [vmem:[%s1939_s28 + $0x4e0] sm:$0xff]  ;;  %v338_v15 = vld [vmem:[%s1939_s28 + $0x4e8] sm:$0xff] }
  0x37   : > { %259 = vst [vmem:[%s1944_s29 + $0x138] sm:$0xff] %v258_v39  ;;  %v340_v16 = vld [vmem:[%s1939_s28 + $0x500] sm:$0xff]  ;;  %v342_v17 = vld [vmem:[%s1939_s28 + $0x508] sm:$0xff] }
  0x38   : > { %261 = vst [vmem:[%s1944_s29 + $0x140] sm:$0xff] %v260_v40  ;;  %v344_v18 = vld [vmem:[%s1939_s28 + $0x520] sm:$0xff]  ;;  %v346_v19 = vld [vmem:[%s1939_s28 + $0x528] sm:$0xff] }
  0x39   : > { %263 = vst [vmem:[%s1944_s29 + $0x148] sm:$0xff] %v262_v41  ;;  %v348_v20 = vld [vmem:[%s1939_s28 + $0x540] sm:$0xff]  ;;  %v350_v21 = vld [vmem:[%s1939_s28 + $0x548] sm:$0xff] }
  0x3a   : > { %265 = vst [vmem:[%s1944_s29 + $0x150] sm:$0xff] %v264_v42  ;;  %v352_v22 = vld [vmem:[%s1939_s28 + $0x560] sm:$0xff]  ;;  %v354_v23 = vld [vmem:[%s1939_s28 + $0x568] sm:$0xff] }
  0x3b   : > { %267 = vst [vmem:[%s1944_s29 + $0x158] sm:$0xff] %v266_v43  ;;  %v356_v24 = vld [vmem:[%s1939_s28 + $0x580] sm:$0xff]  ;;  %v358_v25 = vld [vmem:[%s1939_s28 + $0x588] sm:$0xff] }
  0x3c   : > { %269 = vst [vmem:[%s1944_s29 + $0x160] sm:$0xff] %v268_v44  ;;  %v360_v26 = vld [vmem:[%s1939_s28 + $0x5a0] sm:$0xff]  ;;  %v362_v27 = vld [vmem:[%s1939_s28 + $0x5a8] sm:$0xff] }
  0x3d   : > { %271 = vst [vmem:[%s1944_s29 + $0x168] sm:$0xff] %v270_v45  ;;  %v364_v28 = vld [vmem:[%s1939_s28 + $0x5c0] sm:$0xff]  ;;  %v366_v29 = vld [vmem:[%s1939_s28 + $0x5c8] sm:$0xff] }
  0x3e   : > { %273 = vst [vmem:[%s1944_s29 + $0x170] sm:$0xff] %v272_v46  ;;  %v368_v30 = vld [vmem:[%s1939_s28 + $0x5e0] sm:$0xff]  ;;  %v370_v31 = vld [vmem:[%s1939_s28 + $0x5e8] sm:$0xff] }
  0x3f   : > { %275 = vst [vmem:[%s1944_s29 + $0x178] sm:$0xff] %v274_v47 }
  0x40   : > { %277 = vst [vmem:[%s1944_s29 + $0x180] sm:$0xff] %v276_v48 }
  0x41   : > { %279 = vst [vmem:[%s1944_s29 + $0x188] sm:$0xff] %v278_v49 }
  0x42   : > { %281 = vst [vmem:[%s1944_s29 + $0x190] sm:$0xff] %v280_v50 }
  0x43   : > { %283 = vst [vmem:[%s1944_s29 + $0x198] sm:$0xff] %v282_v51 }
  0x44   : > { %285 = vst [vmem:[%s1944_s29 + $0x1a0] sm:$0xff] %v284_v52 }
  0x45   : > { %287 = vst [vmem:[%s1944_s29 + $0x1a8] sm:$0xff] %v286_v53 }
  0x46   : > { %289 = vst [vmem:[%s1944_s29 + $0x1b0] sm:$0xff] %v288_v54 }
  0x47   : > { %291 = vst [vmem:[%s1944_s29 + $0x1b8] sm:$0xff] %v290_v55 }
  0x48   : > { %293 = vst [vmem:[%s1944_s29 + $0x1c0] sm:$0xff] %v292_v56 }
  0x49   : > { %295 = vst [vmem:[%s1944_s29 + $0x1c8] sm:$0xff] %v294_v57 }
  0x4a   : > { %297 = vst [vmem:[%s1944_s29 + $0x1d0] sm:$0xff] %v296_v58 }
  0x4b   : > { %299 = vst [vmem:[%s1944_s29 + $0x1d8] sm:$0xff] %v298_v59 }
  0x4c   : > { %301 = vst [vmem:[%s1944_s29 + $0x1e0] sm:$0xff] %v300_v60 }
  0x4d   : > { %303 = vst [vmem:[%s1944_s29 + $0x1e8] sm:$0xff] %v302_v61 }
  0x4e   : > { %305 = vst [vmem:[%s1944_s29 + $0x1f0] sm:$0xff] %v304_v62 }
  0x4f   : > { %307 = vst [vmem:[%s1944_s29 + $0x1f8] sm:$0xff] %v306_v63 }
  0x50   : > { %309 = vst [vmem:[%s1944_s29 + $0x200] sm:$0xff] %v308_v0 }
  0x51   : > { %311 = vst [vmem:[%s1944_s29 + $0x208] sm:$0xff] %v310_v1 }
  0x52   : > { %313 = vst [vmem:[%s1944_s29 + $0x210] sm:$0xff] %v312_v2 }
  0x53   : > { %315 = vst [vmem:[%s1944_s29 + $0x218] sm:$0xff] %v314_v3 }
  0x54   : > { %317 = vst [vmem:[%s1944_s29 + $0x220] sm:$0xff] %v316_v4 }
  0x55   : > { %319 = vst [vmem:[%s1944_s29 + $0x228] sm:$0xff] %v318_v5 }
  0x56   : > { %321 = vst [vmem:[%s1944_s29 + $0x230] sm:$0xff] %v320_v6 }
  0x57   : > { %323 = vst [vmem:[%s1944_s29 + $0x238] sm:$0xff] %v322_v7 }
  0x58   : > { %325 = vst [vmem:[%s1944_s29 + $0x240] sm:$0xff] %v324_v8 }
  0x59   : > { %327 = vst [vmem:[%s1944_s29 + $0x248] sm:$0xff] %v326_v9 }
  0x5a   : > { %329 = vst [vmem:[%s1944_s29 + $0x250] sm:$0xff] %v328_v10 }
  0x5b   : > { %331 = vst [vmem:[%s1944_s29 + $0x258] sm:$0xff] %v330_v11 }
  0x5c   : > { %333 = vst [vmem:[%s1944_s29 + $0x260] sm:$0xff] %v332_v12 }
  0x5d   : > { %335 = vst [vmem:[%s1944_s29 + $0x268] sm:$0xff] %v334_v13 }
  0x5e   : > { %337 = vst [vmem:[%s1944_s29 + $0x270] sm:$0xff] %v336_v14 }
  0x5f   : > { %339 = vst [vmem:[%s1944_s29 + $0x278] sm:$0xff] %v338_v15 }
  0x60   : > { %341 = vst [vmem:[%s1944_s29 + $0x280] sm:$0xff] %v340_v16 }
  0x61   : > { %343 = vst [vmem:[%s1944_s29 + $0x288] sm:$0xff] %v342_v17 }
  0x62   : > { %345 = vst [vmem:[%s1944_s29 + $0x290] sm:$0xff] %v344_v18 }
  0x63   : > { %347 = vst [vmem:[%s1944_s29 + $0x298] sm:$0xff] %v346_v19 }
  0x64   : > { %349 = vst [vmem:[%s1944_s29 + $0x2a0] sm:$0xff] %v348_v20 }
  0x65   : > { %351 = vst [vmem:[%s1944_s29 + $0x2a8] sm:$0xff] %v350_v21 }
  0x66   : > { %353 = vst [vmem:[%s1944_s29 + $0x2b0] sm:$0xff] %v352_v22 }
  0x67   : > { %355 = vst [vmem:[%s1944_s29 + $0x2b8] sm:$0xff] %v354_v23 }
  0x68   : > { %357 = vst [vmem:[%s1944_s29 + $0x2c0] sm:$0xff] %v356_v24 }
  0x69   : > { %359 = vst [vmem:[%s1944_s29 + $0x2c8] sm:$0xff] %v358_v25 }
  0x6a   : > { %361 = vst [vmem:[%s1944_s29 + $0x2d0] sm:$0xff] %v360_v26 }
  0x6b   : > { %363 = vst [vmem:[%s1944_s29 + $0x2d8] sm:$0xff] %v362_v27 }
  0x6c   : > { %365 = vst [vmem:[%s1944_s29 + $0x2e0] sm:$0xff] %v364_v28 }
  0x6d   : > { %367 = vst [vmem:[%s1944_s29 + $0x2e8] sm:$0xff] %v366_v29 }
  0x6e   : > { %369 = vst [vmem:[%s1944_s29 + $0x2f0] sm:$0xff] %v368_v30 }
  0x6f   : > { %371 = vst [vmem:[%s1944_s29 + $0x2f8] sm:$0xff] %v370_v31 }
  0x70 PF: > { %p1340_p5 = scmp.ge.s32.totalorder %s1876_s17, 1  ;;  %p376_p6 = scmp.lt.s32.totalorder %s1876_s17, 3 }
  0x72   : > { %p377_p7 = pnand %p1340_p5, %p376_p6 }
  0x73   : > { %s383_s30 = sand.u32 (!%p377_p7), 1, %s1868_s15   ;;  %s1341_s9 = sshll.u32 (!%p377_p7), %s1919_s18, 2 }
  0x74   : > { %380 = sbr.rel (%p377_p7) target bundleno = 485 (0x1e5), region = 47  ;;  %p418_p8 = scmp.lt.s32.totalorder (!%p377_p7), %s1341_s9, 7 }
  0x75   : > { %s1829_s5 = smul.u32 (!%p377_p7), 768, %s383_s30  ;;  %p423_p9 = scmp.lt.s32.totalorder (!%p377_p7), %s1919_s18, 1 }
  0x77   : > { %s2138_s6 = scalar_lea.vmem (!%p377_p7), [#allocation2], %s1829_s5 }
  0x79   : > { %v1459_v32 = vld [vmem:[%s2138_s6 + $0xe0] sm:$0xf]  ;;  %v1762_v33 = vld [vmem:[%s2138_s6 + $0xec] sm:$0xf0]  ;;  %v1760_v41 = vld [vmem:[%s2138_s6 + $0xe4] sm:$0xf] }
  0x7a   : > { %v1587_v34 = vld [vmem:[%s2138_s6 + $0x1e0] sm:$0xf]  ;;  %v1460_v35 = vor.u32 %v1762_v33, %v1459_v32  ;;  %v1794_v36 = vld [vmem:[%s2138_s6 + $0x1ec] sm:$0xf0]  ;;  %v1461_v42 = vld [vmem:[%s2138_s6 + $0xf0] sm:$0xf0] }
  0x7b   : > { %v1715_v37 = vld [vmem:[%s2138_s6 + $0x2e0] sm:$0xf]  ;;  %v1826_v38 = vld [vmem:[%s2138_s6 + $0x2ec] sm:$0xf0]  ;;  %v1588_v39 = vor.u32 %v1794_v36, %v1587_v34  ;;  %v1464_v44 = vor.u32 %v1760_v41, %v1461_v42  ;;  %v1756_v52 = vld [vmem:[%s2138_s6 + $0xc4] sm:$0xf] }
  0x7c   : > { %v1716_v40 = vor.u32 %v1826_v38, %v1715_v37  ;;  %v1443_v43 = vld [vmem:[%s2138_s6 + $0xc0] sm:$0xf]  ;;  %1016 = vmatpush.bf16.msra.mxu0 %v1460_v35  ;;  %v1758_v45 = vld [vmem:[%s2138_s6 + $0xcc] sm:$0xf0]  ;;  %v1445_v54 = vld [vmem:[%s2138_s6 + $0xd0] sm:$0xf0] }
  0x7d   : > { %v1571_v46 = vld [vmem:[%s2138_s6 + $0x1c0] sm:$0xf]  ;;  %v1790_v47 = vld [vmem:[%s2138_s6 + $0x1cc] sm:$0xf0]  ;;  %1029 = vmatpush.bf16.msra.mxu1 %v1588_v39  ;;  %v1444_v48 = vor.u32 %v1758_v45, %v1443_v43  ;;  %1055 = vmatpush.bf16.msra.mxu3 %v1464_v44  ;;  %v1448_v57 = vor.u32 %v1756_v52, %v1445_v54  ;;  %v1752_v63 = vld [vmem:[%s2138_s6 + $0xa4] sm:$0xf] }
  0x7e   : > { %1042 = vmatpush.bf16.msra.mxu2 %v1716_v40  ;;  %v1572_v49 = vor.u32 %v1790_v47, %v1571_v46  ;;  %v1699_v50 = vld [vmem:[%s2138_s6 + $0x2c0] sm:$0xf]  ;;  %v1822_v51 = vld [vmem:[%s2138_s6 + $0x2cc] sm:$0xf0]  ;;  %v1429_v0 = vld [vmem:[%s2138_s6 + $0xb0] sm:$0xf0] }
  0x7f   : > { %v1700_v53 = vor.u32 %v1822_v51, %v1699_v50  ;;  %v1427_v55 = vld [vmem:[%s2138_s6 + $0xa0] sm:$0xf]  ;;  %v1754_v56 = vld [vmem:[%s2138_s6 + $0xac] sm:$0xf0]  ;;  %v1432_v6 = vor.u32 %v1752_v63, %v1429_v0  ;;  %v1748_v10 = vld [vmem:[%s2138_s6 + $0x84] sm:$0xf] }
  0x80   : > { %v1555_v58 = vld [vmem:[%s2138_s6 + $0x1a0] sm:$0xf]  ;;  %v1786_v59 = vld [vmem:[%s2138_s6 + $0x1ac] sm:$0xf0]  ;;  %1017 = vmatpush.bf16.msra.mxu0 %v1444_v48  ;;  %v1428_v61 = vor.u32 %v1754_v56, %v1427_v55  ;;  %v1413_v11 = vld [vmem:[%s2138_s6 + $0x90] sm:$0xf0] }
  0x81   : > { %v1683_v60 = vld [vmem:[%s2138_s6 + $0x2a0] sm:$0xf]  ;;  %v1818_v62 = vld [vmem:[%s2138_s6 + $0x2ac] sm:$0xf0]  ;;  %1030 = vmatpush.bf16.msra.mxu1 %v1572_v49  ;;  %v1556_v1 = vor.u32 %v1786_v59, %v1555_v58  ;;  %1056 = vmatpush.bf16.msra.mxu3 %v1448_v57  ;;  %v1416_v18 = vor.u32 %v1748_v10, %v1413_v11  ;;  %v1744_v22 = vld [vmem:[%s2138_s6 + $0x64] sm:$0xf] }
  0x82   : > { %1043 = vmatpush.bf16.msra.mxu2 %v1700_v53  ;;  %v1684_v2 = vor.u32 %v1818_v62, %v1683_v60  ;;  %v1411_v3 = vld [vmem:[%s2138_s6 + $0x80] sm:$0xf]  ;;  %v1750_v4 = vld [vmem:[%s2138_s6 + $0x8c] sm:$0xf0]  ;;  %v1397_v23 = vld [vmem:[%s2138_s6 + $0x70] sm:$0xf0] }
  0x83   : > { %v1539_v5 = vld [vmem:[%s2138_s6 + $0x180] sm:$0xf]  ;;  %v1782_v7 = vld [vmem:[%s2138_s6 + $0x18c] sm:$0xf0]  ;;  %v1412_v12 = vor.u32 %v1750_v4, %v1411_v3  ;;  %v1400_v30 = vor.u32 %v1744_v22, %v1397_v23  ;;  %v1740_v34 = vld [vmem:[%s2138_s6 + $0x44] sm:$0xf] }
  0x84   : > { %v1667_v8 = vld [vmem:[%s2138_s6 + $0x280] sm:$0xf]  ;;  %v1814_v9 = vld [vmem:[%s2138_s6 + $0x28c] sm:$0xf0]  ;;  %1018 = vmatpush.bf16.msra.mxu0 %v1428_v61  ;;  %v1540_v13 = vor.u32 %v1782_v7, %v1539_v5  ;;  %v1381_v35 = vld [vmem:[%s2138_s6 + $0x50] sm:$0xf0] }
  0x85   : > { %1031 = vmatpush.bf16.msra.mxu1 %v1556_v1  ;;  %v1668_v14 = vor.u32 %v1814_v9, %v1667_v8  ;;  %v1395_v15 = vld [vmem:[%s2138_s6 + $0x60] sm:$0xf]  ;;  %v1746_v16 = vld [vmem:[%s2138_s6 + $0x6c] sm:$0xf0]  ;;  %1057 = vmatpush.bf16.msra.mxu3 %v1432_v6  ;;  %v1384_v42 = vor.u32 %v1740_v34, %v1381_v35  ;;  %v1736_v46 = vld [vmem:[%s2138_s6 + $0x24] sm:$0xf] }
  0x86   : > { %1044 = vmatpush.bf16.msra.mxu2 %v1684_v2  ;;  %v1523_v17 = vld [vmem:[%s2138_s6 + $0x160] sm:$0xf]  ;;  %v1778_v19 = vld [vmem:[%s2138_s6 + $0x16c] sm:$0xf0]  ;;  %v1396_v24 = vor.u32 %v1746_v16, %v1395_v15  ;;  %v1365_v47 = vld [vmem:[%s2138_s6 + $0x30] sm:$0xf0] }
  0x87   : > { %v1651_v20 = vld [vmem:[%s2138_s6 + $0x260] sm:$0xf]  ;;  %v1810_v21 = vld [vmem:[%s2138_s6 + $0x26c] sm:$0xf0]  ;;  %v1524_v25 = vor.u32 %v1778_v19, %v1523_v17  ;;  %v1368_v56 = vor.u32 %v1736_v46, %v1365_v47  ;;  %v1732_v58 = vld [vmem:[%s2138_s6 + $0x4] sm:$0xf] }
  0x88   : > { %1019 = vmatpush.bf16.msra.mxu0 %v1412_v12  ;;  %v1652_v26 = vor.u32 %v1810_v21, %v1651_v20  ;;  %v1379_v27 = vld [vmem:[%s2138_s6 + $0x40] sm:$0xf]  ;;  %v1742_v28 = vld [vmem:[%s2138_s6 + $0x4c] sm:$0xf0]  ;;  %v1349_v59 = vld [vmem:[%s2138_s6 + $0x10] sm:$0xf0] }
  0x89   : > { %1032 = vmatpush.bf16.msra.mxu1 %v1540_v13  ;;  %v1507_v29 = vld [vmem:[%s2138_s6 + $0x140] sm:$0xf]  ;;  %1058 = vmatpush.bf16.msra.mxu3 %v1416_v18  ;;  %v1774_v31 = vld [vmem:[%s2138_s6 + $0x14c] sm:$0xf0]  ;;  %v1380_v36 = vor.u32 %v1742_v28, %v1379_v27  ;;  %v1792_v60 = vld [vmem:[%s2138_s6 + $0x1e4] sm:$0xf]  ;;  %v1352_v7 = vor.u32 %v1732_v58, %v1349_v59 }
  0x8a   : > { %1045 = vmatpush.bf16.msra.mxu2 %v1668_v14  ;;  %v1635_v32 = vld [vmem:[%s2138_s6 + $0x240] sm:$0xf]  ;;  %v1806_v33 = vld [vmem:[%s2138_s6 + $0x24c] sm:$0xf0]  ;;  %v1508_v37 = vor.u32 %v1774_v31, %v1507_v29  ;;  %v1589_v61 = vld [vmem:[%s2138_s6 + $0x1f0] sm:$0xf0] }
  0x8b   : > { %v1636_v38 = vor.u32 %v1806_v33, %v1635_v32  ;;  %v1363_v39 = vld [vmem:[%s2138_s6 + $0x20] sm:$0xf]  ;;  %v1738_v40 = vld [vmem:[%s2138_s6 + $0x2c] sm:$0xf0]  ;;  %v1824_v62 = vld [vmem:[%s2138_s6 + $0x2e4] sm:$0xf]  ;;  %v1592_v8 = vor.u32 %v1792_v60, %v1589_v61 }
  0x8c   : > { %1020 = vmatpush.bf16.msra.mxu0 %v1396_v24  ;;  %v1491_v41 = vld [vmem:[%s2138_s6 + $0x120] sm:$0xf]  ;;  %v1770_v43 = vld [vmem:[%s2138_s6 + $0x12c] sm:$0xf0]  ;;  %v1364_v48 = vor.u32 %v1738_v40, %v1363_v39  ;;  %v1717_v0 = vld [vmem:[%s2138_s6 + $0x2f0] sm:$0xf0] }
  0x8d   : > { %1033 = vmatpush.bf16.msra.mxu1 %v1524_v25  ;;  %1059 = vmatpush.bf16.msra.mxu3 %v1400_v30  ;;  %v1619_v44 = vld [vmem:[%s2138_s6 + $0x220] sm:$0xf]  ;;  %v1802_v45 = vld [vmem:[%s2138_s6 + $0x22c] sm:$0xf0]  ;;  %v1492_v51 = vor.u32 %v1770_v43, %v1491_v41  ;;  %v1467_v1 = vld [vmem:[%s2138_s6 + $0xe8] sm:$0xf]  ;;  %v1720_v9 = vor.u32 %v1824_v62, %v1717_v0 }
  0x8e   : > { %1046 = vmatpush.bf16.msra.mxu2 %v1652_v26  ;;  %v1347_v49 = vld [vmem:[%s2138_s6] sm:$0xf]  ;;  %v1734_v50 = vld [vmem:[%s2138_s6 + $0xc] sm:$0xf0]  ;;  %v1620_v52 = vor.u32 %v1802_v45, %v1619_v44  ;;  %v1763_v2 = vld [vmem:[%s2138_s6 + $0xf4] sm:$0xf0] }
  0x8f   : > { %v1475_v53 = vld [vmem:[%s2138_s6 + $0x100] sm:$0xf]  ;;  %v1766_v54 = vld [vmem:[%s2138_s6 + $0x10c] sm:$0xf0]  ;;  %v1348_v63 = vor.u32 %v1734_v50, %v1347_v49  ;;  %v1595_v5 = vld [vmem:[%s2138_s6 + $0x1e8] sm:$0xf]  ;;  %v1468_v10 = vor.u32 %v1763_v2, %v1467_v1 }
  0x90   : > { %1021 = vmatpush.bf16.msra.mxu0 %v1380_v36  ;;  %v1603_v55 = vld [vmem:[%s2138_s6 + $0x200] sm:$0xf]  ;;  %v1798_v57 = vld [vmem:[%s2138_s6 + $0x20c] sm:$0xf0]  ;;  %v1476_v3 = vor.u32 %v1766_v54, %v1475_v53  ;;  %v1795_v6 = vld [vmem:[%s2138_s6 + $0x1f4] sm:$0xf0] }
  0x91   : > { %1034 = vmatpush.bf16.msra.mxu1 %v1508_v37  ;;  %1060 = vmatpush.bf16.msra.mxu3 %v1384_v42  ;;  %v1604_v4 = vor.u32 %v1798_v57, %v1603_v55  ;;  %v1788_v11 = vld [vmem:[%s2138_s6 + $0x1c4] sm:$0xf]  ;;  %v1573_v12 = vld [vmem:[%s2138_s6 + $0x1d0] sm:$0xf0]  ;;  %v1596_v14 = vor.u32 %v1795_v6, %v1595_v5  ;;  %v1451_v16 = vld [vmem:[%s2138_s6 + $0xc8] sm:$0xf] }
  0x92   : > { %1047 = vmatpush.bf16.msra.mxu2 %v1636_v38  ;;  %v1820_v13 = vld [vmem:[%s2138_s6 + $0x2c4] sm:$0xf]  ;;  %v1701_v15 = vld [vmem:[%s2138_s6 + $0x2d0] sm:$0xf0]  ;;  %v1759_v17 = vld [vmem:[%s2138_s6 + $0xd4] sm:$0xf0]  ;;  %v1576_v21 = vor.u32 %v1788_v11, %v1573_v12 }
  0x93   : > { %v1579_v18 = vld [vmem:[%s2138_s6 + $0x1c8] sm:$0xf]  ;;  %v1791_v19 = vld [vmem:[%s2138_s6 + $0x1d4] sm:$0xf0]  ;;  %v1704_v22 = vor.u32 %v1820_v13, %v1701_v15  ;;  %v1452_v23 = vor.u32 %v1759_v17, %v1451_v16  ;;  %v1784_v24 = vld [vmem:[%s2138_s6 + $0x1a4] sm:$0xf] }
  0x94   : > { %1022 = vmatpush.bf16.msra.mxu0 %v1364_v48  ;;  %v431_v20 = vld [vmem:[%s2390_s1] sm:$0x3f]  ;;  %v1557_v25 = vld [vmem:[%s2138_s6 + $0x1b0] sm:$0xf0]  ;;  %v1816_v26 = vld [vmem:[%s2138_s6 + $0x2a4] sm:$0xf]  ;;  %v1580_v27 = vor.u32 %v1791_v19, %v1579_v18 }
  0x95   : > { %1035 = vmatpush.bf16.msra.mxu1 %v1492_v51  ;;  %1061 = vmatpush.bf16.msra.mxu3 %v1368_v56  ;;  %529 = vst [vmem:[#allocation1] ss:$4 sm:$0xff] %v431_v20  ;;  %v1685_v28 = vld [vmem:[%s2138_s6 + $0x2b0] sm:$0xf0]  ;;  %v1435_v29 = vld [vmem:[%s2138_s6 + $0xa8] sm:$0xf]  ;;  %v1560_v33 = vor.u32 %v1784_v24, %v1557_v25 }
  0x96   : > { %1048 = vmatpush.bf16.msra.mxu2 %v1620_v52  ;;  %v1755_v30 = vld [vmem:[%s2138_s6 + $0xb4] sm:$0xf0]  ;;  %v1563_v31 = vld [vmem:[%s2138_s6 + $0x1a8] sm:$0xf]  ;;  %v1780_v34 = vld [vmem:[%s2138_s6 + $0x184] sm:$0xf]  ;;  %v1688_v36 = vor.u32 %v1816_v26, %v1685_v28 }
  0x97   : > { %v1787_v32 = vld [vmem:[%s2138_s6 + $0x1b4] sm:$0xf0]  ;;  %v1541_v35 = vld [vmem:[%s2138_s6 + $0x190] sm:$0xf0]  ;;  %v1436_v37 = vor.u32 %v1755_v30, %v1435_v29  ;;  %v1812_v38 = vld [vmem:[%s2138_s6 + $0x284] sm:$0xf] }
  0x98   : > { %1023 = vmatpush.bf16.msra.mxu0 %v1348_v63  ;;  %v1669_v39 = vld [vmem:[%s2138_s6 + $0x290] sm:$0xf0]  ;;  %v1419_v40 = vld [vmem:[%s2138_s6 + $0x88] sm:$0xf]  ;;  %v1564_v41 = vor.u32 %v1787_v32, %v1563_v31  ;;  %v1751_v42 = vld [vmem:[%s2138_s6 + $0x94] sm:$0xf0]  ;;  %v1544_v47 = vor.u32 %v1780_v34, %v1541_v35 }
  0x99   : > { %1036 = vmatpush.bf16.msra.mxu1 %v1476_v3  ;;  %1062 = vmatpush.bf16.msra.mxu3 %v1352_v7  ;;  %v1547_v43 = vld [vmem:[%s2138_s6 + $0x188] sm:$0xf]  ;;  %v1783_v44 = vld [vmem:[%s2138_s6 + $0x194] sm:$0xf0]  ;;  %v1672_v49 = vor.u32 %v1812_v38, %v1669_v39  ;;  %v1420_v50 = vor.u32 %v1751_v42, %v1419_v40  ;;  %v1776_v51 = vld [vmem:[%s2138_s6 + $0x164] sm:$0xf] }
  0x9a   : > { %1049 = vmatpush.bf16.msra.mxu2 %v1604_v4  ;;  %v1525_v52 = vld [vmem:[%s2138_s6 + $0x170] sm:$0xf0]  ;;  %v1808_v53 = vld [vmem:[%s2138_s6 + $0x264] sm:$0xf]  ;;  %v1548_v54 = vor.u32 %v1783_v44, %v1547_v43  ;;  %v1403_v56 = vld [vmem:[%s2138_s6 + $0x68] sm:$0xf] }
  0x9b   : > { %v1653_v55 = vld [vmem:[%s2138_s6 + $0x270] sm:$0xf0]  ;;  %v1747_v57 = vld [vmem:[%s2138_s6 + $0x74] sm:$0xf0]  ;;  %v1531_v58 = vld [vmem:[%s2138_s6 + $0x168] sm:$0xf]  ;;  %v1528_v60 = vor.u32 %v1776_v51, %v1525_v52 }
  0x9c   : > { %1068 = vmatpush.bf16.msrb.mxu0 %v1592_v8  ;;  %v2239_v45 = vld.sshfl [vmem:[#allocation1] sm:$0xff pattern:$0x73625140]  ;;  %v2241_v46 = vld.sshfl [vmem:[#allocation1 + $0x8] sm:$0xff pattern:$0x73625140]  ;;  %v1656_v61 = vor.u32 %v1808_v53, %v1653_v55  ;;  %v1404_v62 = vor.u32 %v1747_v57, %v1403_v56 }
  0x9d   : > { %1081 = vmatpush.bf16.msrb.mxu1 %v1720_v9  ;;  %1107 = vmatpush.bf16.msrb.mxu3 %v1596_v14  ;;  %v2244_v48 = vld.sshfl [vmem:[#allocation1 + $0x10] sm:$0xff pattern:$0x73625140]  ;;  %v1779_v59 = vld [vmem:[%s2138_s6 + $0x174] sm:$0xf0]  ;;  %s2398_s9 = smov (!%p418_p8, %s1341_s9), 7 }
  0x9e   : > { %1094 = vmatpush.bf16.msrb.mxu2 %v1468_v10  ;;  %1037 = vmatmul.bf16.vlgmr.msra.gmra.mxu1 %v2241_v46  ;;  %v1772_v63 = vld [vmem:[%s2138_s6 + $0x144] sm:$0xf]  ;;  %v1509_v0 = vld [vmem:[%s2138_s6 + $0x150] sm:$0xf0]  ;;  %v1532_v2 = vor.u32 %v1779_v59, %v1531_v58  ;;  %v1387_v4 = vld [vmem:[%s2138_s6 + $0x48] sm:$0xf] }
  0x9f   : > { %1024 = vmatmul.bf16.vlgmr.msra.gmra.mxu0 %v2239_v45  ;;  %1050 = vmatmul.bf16.vlgmr.msra.gmra.mxu2 %v2244_v48  ;;  %v1804_v1 = vld [vmem:[%s2138_s6 + $0x244] sm:$0xf]  ;;  %v1637_v3 = vld [vmem:[%s2138_s6 + $0x250] sm:$0xf0]  ;;  %v1743_v5 = vld [vmem:[%s2138_s6 + $0x54] sm:$0xf0]  ;;  %v1512_v8 = vor.u32 %v1772_v63, %v1509_v0 }
  0xa0   : > { %1069 = vmatpush.bf16.msrb.mxu0 %v1576_v21  ;;  %1063 = vmatmul.bf16.vlgmr.msra.gmra.mxu3 %v2239_v45  ;;  %v1515_v6 = vld [vmem:[%s2138_s6 + $0x148] sm:$0xf]  ;;  %v1775_v7 = vld [vmem:[%s2138_s6 + $0x154] sm:$0xf0]  ;;  %v1640_v9 = vor.u32 %v1804_v1, %v1637_v3  ;;  %v1388_v10 = vor.u32 %v1743_v5, %v1387_v4  ;;  %v1768_v11 = vld [vmem:[%s2138_s6 + $0x124] sm:$0xf] }
  0xa1   : > { %1082 = vmatpush.bf16.msrb.mxu1 %v1704_v22  ;;  %1108 = vmatpush.bf16.msrb.mxu3 %v1580_v27  ;;  %v1493_v12 = vld [vmem:[%s2138_s6 + $0x130] sm:$0xf0]  ;;  %v1800_v13 = vld [vmem:[%s2138_s6 + $0x224] sm:$0xf]  ;;  %v1516_v14 = vor.u32 %v1775_v7, %v1515_v6  ;;  %v1371_v16 = vld [vmem:[%s2138_s6 + $0x28] sm:$0xf] }
  0xa2   : > { %1095 = vmatpush.bf16.msrb.mxu2 %v1452_v23  ;;  %v1621_v15 = vld [vmem:[%s2138_s6 + $0x230] sm:$0xf0]  ;;  %v1739_v17 = vld [vmem:[%s2138_s6 + $0x34] sm:$0xf0]  ;;  %v1499_v18 = vld [vmem:[%s2138_s6 + $0x128] sm:$0xf]  ;;  %v1496_v20 = vor.u32 %v1768_v11, %v1493_v12 }
  0xa3   : > { %v1771_v19 = vld [vmem:[%s2138_s6 + $0x134] sm:$0xf0]  ;;  %v1764_v21 = vld [vmem:[%s2138_s6 + $0x104] sm:$0xf]  ;;  %v1477_v22 = vld [vmem:[%s2138_s6 + $0x110] sm:$0xf0]  ;;  %v1624_v23 = vor.u32 %v1800_v13, %v1621_v15  ;;  %v1372_v24 = vor.u32 %v1739_v17, %v1371_v16 }
  0xa4   : > { %1070 = vmatpush.bf16.msrb.mxu0 %v1560_v33  ;;  %v1796_v25 = vld [vmem:[%s2138_s6 + $0x204] sm:$0xf]  ;;  %v1605_v26 = vld [vmem:[%s2138_s6 + $0x210] sm:$0xf0]  ;;  %v1355_v27 = vld [vmem:[%s2138_s6 + $0x8] sm:$0xf]  ;;  %v1500_v28 = vor.u32 %v1771_v19, %v1499_v18  ;;  %v1480_v35 = vor.u32 %v1764_v21, %v1477_v22 }
  0xa5   : > { %1083 = vmatpush.bf16.msrb.mxu1 %v1688_v36  ;;  %1109 = vmatpush.bf16.msrb.mxu3 %v1564_v41  ;;  %v1735_v29 = vld [vmem:[%s2138_s6 + $0x14] sm:$0xf0]  ;;  %v1483_v30 = vld [vmem:[%s2138_s6 + $0x108] sm:$0xf]  ;;  %v1761_v34 = vld [vmem:[%s2138_s6 + $0xec] sm:$0xf]  ;;  %v1608_v39 = vor.u32 %v1796_v25, %v1605_v26 }
  0xa6   : > { %1096 = vmatpush.bf16.msrb.mxu2 %v1436_v37  ;;  %v1767_v31 = vld [vmem:[%s2138_s6 + $0x114] sm:$0xf0]  ;;  %v1723_v32 = vld [vmem:[%s2138_s6 + $0x2e8] sm:$0xf]  ;;  %v1469_v36 = vld [vmem:[%s2138_s6 + $0xf8] sm:$0xf0]  ;;  %v1356_v40 = vor.u32 %v1735_v29, %v1355_v27 }
  0xa7   : > { %v1827_v33 = vld [vmem:[%s2138_s6 + $0x2f4] sm:$0xf0]  ;;  %v1793_v37 = vld [vmem:[%s2138_s6 + $0x1ec] sm:$0xf]  ;;  %v1597_v38 = vld [vmem:[%s2138_s6 + $0x1f8] sm:$0xf0]  ;;  %v1484_v43 = vor.u32 %v1767_v31, %v1483_v30 }
  0xa8   : > { %1071 = vmatpush.bf16.msrb.mxu0 %v1544_v47  ;;  %v1825_v41 = vld [vmem:[%s2138_s6 + $0x2ec] sm:$0xf]  ;;  %v1725_v42 = vld [vmem:[%s2138_s6 + $0x2f8] sm:$0xf0]  ;;  %v1724_v44 = vor.u32 %v1827_v33, %v1723_v32  ;;  %v1472_v47 = vor.u32 %v1761_v34, %v1469_v36  ;;  %v1823_v51 = vld [vmem:[%s2138_s6 + $0x2d4] sm:$0xf0] }
  0xa9   : > { %1084 = vmatpush.bf16.msrb.mxu1 %v1672_v49  ;;  %1110 = vmatpush.bf16.msrb.mxu3 %v1548_v54  ;;  %v1600_v49 = vor.u32 %v1793_v37, %v1597_v38  ;;  %v1757_v52 = vld [vmem:[%s2138_s6 + $0xcc] sm:$0xf]  ;;  %v1728_v53 = vor.u32 %v1825_v41, %v1725_v42  ;;  %v1453_v54 = vld [vmem:[%s2138_s6 + $0xd8] sm:$0xf0]  ;;  %v1819_v63 = vld [vmem:[%s2138_s6 + $0x2b4] sm:$0xf0] }
  0xaa   : > { %1097 = vmatpush.bf16.msrb.mxu2 %v1420_v50  ;;  %v1707_v50 = vld [vmem:[%s2138_s6 + $0x2c8] sm:$0xf]  ;;  %v1789_v55 = vld [vmem:[%s2138_s6 + $0x1cc] sm:$0xf]  ;;  %v1581_v56 = vld [vmem:[%s2138_s6 + $0x1d8] sm:$0xf0] }
  0xab   : > { %v1821_v57 = vld [vmem:[%s2138_s6 + $0x2cc] sm:$0xf]  ;;  %v1709_v58 = vld [vmem:[%s2138_s6 + $0x2d8] sm:$0xf0]  ;;  %v1708_v59 = vor.u32 %v1823_v51, %v1707_v50  ;;  %v1815_v11 = vld [vmem:[%s2138_s6 + $0x294] sm:$0xf0] }
  0xac   : > { %1072 = vmatpush.bf16.msrb.mxu0 %v1528_v60  ;;  %v1456_v60 = vor.u32 %v1757_v52, %v1453_v54  ;;  %v1753_v0 = vld [vmem:[%s2138_s6 + $0xac] sm:$0xf]  ;;  %v1712_v1 = vor.u32 %v1821_v57, %v1709_v58  ;;  %v1565_v4 = vld [vmem:[%s2138_s6 + $0x1b8] sm:$0xf0]  ;;  %v1659_v22 = vld [vmem:[%s2138_s6 + $0x268] sm:$0xf] }
  0xad   : > { %1085 = vmatpush.bf16.msrb.mxu1 %v1656_v61  ;;  %1111 = vmatpush.bf16.msrb.mxu3 %v1532_v2  ;;  %v1584_v61 = vor.u32 %v1789_v55, %v1581_v56  ;;  %v1437_v2 = vld [vmem:[%s2138_s6 + $0xb8] sm:$0xf0]  ;;  %v1785_v3 = vld [vmem:[%s2138_s6 + $0x1ac] sm:$0xf]  ;;  %v1643_v34 = vld [vmem:[%s2138_s6 + $0x248] sm:$0xf] }
  0xae   : > { %1098 = vmatpush.bf16.msrb.mxu2 %v1404_v62  ;;  %v1691_v62 = vld [vmem:[%s2138_s6 + $0x2a8] sm:$0xf]  ;;  %v1817_v5 = vld [vmem:[%s2138_s6 + $0x2ac] sm:$0xf]  ;;  %v1693_v6 = vld [vmem:[%s2138_s6 + $0x2b8] sm:$0xf0] }
  0xaf   : > { %v1692_v7 = vor.u32 %v1819_v63, %v1691_v62  ;;  %v1749_v12 = vld [vmem:[%s2138_s6 + $0x8c] sm:$0xf]  ;;  %v1696_v13 = vor.u32 %v1817_v5, %v1693_v6  ;;  %v1549_v16 = vld [vmem:[%s2138_s6 + $0x198] sm:$0xf0]  ;;  %v1803_v50 = vld [vmem:[%s2138_s6 + $0x234] sm:$0xf0] }
  0xb0   : > { %1073 = vmatpush.bf16.msrb.mxu0 %v1512_v8  ;;  %v1440_v8 = vor.u32 %v1753_v0, %v1437_v2  ;;  %v1781_v15 = vld [vmem:[%s2138_s6 + $0x18c] sm:$0xf]  ;;  %v1677_v18 = vld [vmem:[%s2138_s6 + $0x298] sm:$0xf0]  ;;  %v1799_v62 = vld [vmem:[%s2138_s6 + $0x214] sm:$0xf0] }
  0xb1   : > { %1086 = vmatpush.bf16.msrb.mxu1 %v1640_v9  ;;  %1112 = vmatpush.bf16.msrb.mxu3 %v1516_v14  ;;  %v1568_v9 = vor.u32 %v1785_v3, %v1565_v4  ;;  %v1421_v14 = vld [vmem:[%s2138_s6 + $0x98] sm:$0xf0]  ;;  %v1813_v17 = vld [vmem:[%s2138_s6 + $0x28c] sm:$0xf]  ;;  %v1552_v21 = vor.u32 %v1781_v15, %v1549_v16  ;;  %s1342_s10 = sshll.u32 %s2398_s9, 2  ;;  %vm1178_vm0 = vcmask 1043456  }
  0xb2   : > { %1099 = vmatpush.bf16.msrb.mxu2 %v1388_v10  ;;  %v1675_v10 = vld [vmem:[%s2138_s6 + $0x288] sm:$0xf]  ;;  %v1680_v25 = vor.u32 %v1813_v17, %v1677_v18  ;;  %v1405_v26 = vld [vmem:[%s2138_s6 + $0x78] sm:$0xf0]  ;;  %v1777_v27 = vld [vmem:[%s2138_s6 + $0x16c] sm:$0xf]  ;;  %s2357_s13 = scalar_lea.vmem %s2391_s2, %s1342_s10 }
  0xb3   : > { %v1676_v19 = vor.u32 %v1815_v11, %v1675_v10  ;;  %v1809_v29 = vld [vmem:[%s2138_s6 + $0x26c] sm:$0xf]  ;;  %v1661_v30 = vld [vmem:[%s2138_s6 + $0x278] sm:$0xf0]  ;;  %s2400_s18 = smov (!%p423_p9, %s1919_s18), 1  ;;  %vm1194_vm1 = vcmask 3072  }
  0xb4   : > { %1074 = vmatpush.bf16.msrb.mxu0 %v1496_v20  ;;  %v1424_v20 = vor.u32 %v1749_v12, %v1421_v14  ;;  %v1741_v36 = vld [vmem:[%s2138_s6 + $0x4c] sm:$0xf]  ;;  %v1664_v37 = vor.u32 %v1809_v29, %v1661_v30  ;;  %v1389_v38 = vld [vmem:[%s2138_s6 + $0x58] sm:$0xf0]  ;;  %s1343_s14 = sshll.u32 %s2400_s18, 2 }
  0xb5   : > { %1087 = vmatpush.bf16.msrb.mxu1 %v1624_v23  ;;  %1113 = vmatpush.bf16.msrb.mxu3 %v1500_v28  ;;  %v1811_v23 = vld [vmem:[%s2138_s6 + $0x274] sm:$0xf0]  ;;  %v1533_v28 = vld [vmem:[%s2138_s6 + $0x178] sm:$0xf0]  ;;  %v1805_v41 = vld [vmem:[%s2138_s6 + $0x24c] sm:$0xf]  ;;  %s426_s20 = scalar_lea.vmem %s2392_s3, %s1343_s14  ;;  %s430_s24 = scalar_lea.vmem %s2393_s4, %s1343_s14 }
  0xb6   : > { %1100 = vmatpush.bf16.msrb.mxu2 %v1372_v24  ;;  %v1745_v24 = vld [vmem:[%s2138_s6 + $0x6c] sm:$0xf]  ;;  %v1660_v31 = vor.u32 %v1811_v23, %v1659_v22  ;;  %v1536_v33 = vor.u32 %v1777_v27, %v1533_v28  ;;  %v1645_v42 = vld [vmem:[%s2138_s6 + $0x258] sm:$0xf0] }
  0xb7   : > { %v1408_v32 = vor.u32 %v1745_v24, %v1405_v26  ;;  %v1737_v51 = vld [vmem:[%s2138_s6 + $0x2c] sm:$0xf]  ;;  %v1648_v52 = vor.u32 %v1805_v41, %v1645_v42  ;;  %v1501_v55 = vld [vmem:[%s2138_s6 + $0x138] sm:$0xf0] }
  0xb8   : > { %1075 = vmatpush.bf16.msrb.mxu0 %v1480_v35  ;;  %v1807_v35 = vld [vmem:[%s2138_s6 + $0x254] sm:$0xf0]  ;;  %v1769_v54 = vld [vmem:[%s2138_s6 + $0x12c] sm:$0xf]  ;;  %v1629_v57 = vld [vmem:[%s2138_s6 + $0x238] sm:$0xf0] }
  0xb9   : > { %1088 = vmatpush.bf16.msrb.mxu1 %v1608_v39  ;;  %1114 = vmatpush.bf16.msrb.mxu3 %v1484_v43  ;;  %v1773_v39 = vld [vmem:[%s2138_s6 + $0x14c] sm:$0xf]  ;;  %v1644_v43 = vor.u32 %v1807_v35, %v1643_v34  ;;  %v1485_v3 = vld [vmem:[%s2138_s6 + $0x118] sm:$0xf0] }
  0xba   : > { %1101 = vmatpush.bf16.msrb.mxu2 %v1356_v40  ;;  %v1517_v40 = vld [vmem:[%s2138_s6 + $0x158] sm:$0xf0]  ;;  %v1801_v56 = vld [vmem:[%s2138_s6 + $0x22c] sm:$0xf] }
  0xbb   : > { %1076 = vmatmul.bf16.vlgmr.msrb.gmra.mxu0 %v2241_v46  ;;  %v1733_v63 = vld [vmem:[%s2138_s6 + $0xc] sm:$0xf]  ;;  %v1632_v0 = vor.u32 %v1801_v56, %v1629_v57  ;;  %v1613_v5 = vld [vmem:[%s2138_s6 + $0x218] sm:$0xf0] }
  0xbc   : > { %1120 = vmatpush.bf16.msra.mxu0 %v1724_v44  ;;  %1089 = vmatmul.bf16.vlgmr.msrb.gmra.mxu1 %v2244_v48  ;;  %v1392_v44 = vor.u32 %v1741_v36, %v1389_v38  ;;  %v1765_v2 = vld [vmem:[%s2138_s6 + $0x10c] sm:$0xf] }
  0xbd   : > { %1133 = vmatpush.bf16.msra.mxu1 %v1472_v47  ;;  %1159 = vmatpush.bf16.msra.mxu3 %v1728_v53  ;;  %v1520_v47 = vor.u32 %v1773_v39, %v1517_v40  ;;  %v1373_v53 = vld [vmem:[%s2138_s6 + $0x38] sm:$0xf0]  ;;  %v1797_v4 = vld [vmem:[%s2138_s6 + $0x20c] sm:$0xf] }
  0xbe   : > { %1146 = vmatpush.bf16.msra.mxu2 %v1600_v49  ;;  %1115 = vmatmul.bf16.vlgmr.msrb.gmra.mxu3 %v2241_v46  ;;  %v1627_v49 = vld [vmem:[%s2138_s6 + $0x228] sm:$0xf] }
  0xbf   : > { %1102 = vmatmul.bf16.vlgmr.msrb.gmra.mxu2 %v2239_v45  ;;  %v1628_v58 = vor.u32 %v1803_v50, %v1627_v49 }
  0xc0   : > { %1121 = vmatpush.bf16.msra.mxu0 %v1708_v59  ;;  %v1376_v59 = vor.u32 %v1737_v51, %v1373_v53 }
  0xc1   : > { %1134 = vmatpush.bf16.msra.mxu1 %v1456_v60  ;;  %1160 = vmatpush.bf16.msra.mxu3 %v1712_v1  ;;  %v1504_v60 = vor.u32 %v1769_v54, %v1501_v55  ;;  %v1357_v1 = vld [vmem:[%s2138_s6 + $0x18] sm:$0xf0] }
  0xc2   : > { %1147 = vmatpush.bf16.msra.mxu2 %v1584_v61  ;;  %v1611_v61 = vld [vmem:[%s2138_s6 + $0x208] sm:$0xf] }
  0xc3   : > { %v1612_v6 = vor.u32 %v1799_v62, %v1611_v61 }
  0xc4   : > { %1122 = vmatpush.bf16.msra.mxu0 %v1692_v7  ;;  %v1360_v7 = vor.u32 %v1733_v63, %v1357_v1 }
  0xc5   : > { %1135 = vmatpush.bf16.msra.mxu1 %v1440_v8  ;;  %1161 = vmatpush.bf16.msra.mxu3 %v1696_v13  ;;  %v1488_v8 = vor.u32 %v1765_v2, %v1485_v3 }
  0xc6   : > { %1148 = vmatpush.bf16.msra.mxu2 %v1568_v9  ;;  %v1616_v9 = vor.u32 %v1797_v4, %v1613_v5 }
  0xc8   : > { %1123 = vmatpush.bf16.msra.mxu0 %v1676_v19 }
  0xc9   : > { %1136 = vmatpush.bf16.msra.mxu1 %v1424_v20  ;;  %1162 = vmatpush.bf16.msra.mxu3 %v1680_v25 }
  0xca   : > { %1149 = vmatpush.bf16.msra.mxu2 %v1552_v21 }
  0xcc   : > { %1124 = vmatpush.bf16.msra.mxu0 %v1660_v31 }
  0xcd   : > { %1137 = vmatpush.bf16.msra.mxu1 %v1408_v32  ;;  %1163 = vmatpush.bf16.msra.mxu3 %v1664_v37 }
  0xce   : > { %1150 = vmatpush.bf16.msra.mxu2 %v1536_v33 }
  0xd0   : > { %1125 = vmatpush.bf16.msra.mxu0 %v1644_v43 }
  0xd1   : > { %1138 = vmatpush.bf16.msra.mxu1 %v1392_v44  ;;  %1164 = vmatpush.bf16.msra.mxu3 %v1648_v52 }
  0xd2   : > { %1151 = vmatpush.bf16.msra.mxu2 %v1520_v47 }
  0xd4   : > { %1126 = vmatpush.bf16.msra.mxu0 %v1628_v58 }
  0xd5   : > { %1139 = vmatpush.bf16.msra.mxu1 %v1376_v59  ;;  %1165 = vmatpush.bf16.msra.mxu3 %v1632_v0 }
  0xd6   : > { %1152 = vmatpush.bf16.msra.mxu2 %v1504_v60 }
  0xd8   : > { %1127 = vmatpush.bf16.msra.mxu0 %v1612_v6 }
  0xd9   : > { %1140 = vmatpush.bf16.msra.mxu1 %v1360_v7  ;;  %1166 = vmatpush.bf16.msra.mxu3 %v1616_v9 }
  0xda   : > { %1153 = vmatpush.bf16.msra.mxu2 %v1488_v8 }
  0xdb   : > { %1128 = vmatmul.bf16.vlgmr.msra.gmra.mxu0 %v2244_v48 }
  0xdc   : > { %1141 = vmatmul.bf16.vlgmr.msra.gmra.mxu1 %v2239_v45  ;;  %1167 = vmatmul.bf16.vlgmr.msra.gmra.mxu3 %v2244_v48 }
  0xdd   : > { %1154 = vmatmul.bf16.vlgmr.msra.gmra.mxu2 %v2241_v46 }
 0x11b   : > { %v1038_v10 = vpop.f32.mrf.mxu1 }
 0x11c   : > { %v1025_v11 = vpop.f32.mrf.mxu0 }
 0x11d   : > { %v1039_v18 = vadd.f32 %v1038_v10, %v1025_v11 }
 0x122   : > { %v1051_v13 = vpop.f32.mrf.mxu2 }
 0x123   : > { %v1040_v12 = vpop.f32.mrf.mxu1  ;;  %v1064_v14 = vpop.f32.mrf.mxu3  ;;  %v1052_v45 = vadd.f32 %v1051_v13, %v1039_v18 }
 0x124   : > { %v1027_v15 = vpop.f32.mrf.mxu0 }
 0x125   : > { %v1185_v33 = vsel %vm1178_vm0, %v1052_v45, 0.0  ;;  %v1196_v42 = vmul.f32 %v1052_v45, %v1052_v45 }
 0x127   : > { %v1200_v55 = vsel %vm1178_vm0, %v1196_v42, 0.0 }
 0x12a   : > { %v1053_v16 = vpop.f32.mrf.mxu2 }
 0x12b   : > { %v1066_v17 = vpop.f32.mrf.mxu3 }
 0x138   : > { %v1077_v19 = vpop.f32.mrf.mxu0 }
 0x139   : > { %v1078_v20 = vadd.f32 %v1077_v19, %v1064_v14  ;;  %v1090_v21 = vpop.f32.mrf.mxu1 }
 0x13b   : > { %v1091_v46 = vadd.f32 %v1090_v21, %v1078_v20 }
 0x13d   : > { %v1176_v48 = vrot.slane %v1091_v46, 4  ;;  %v1186_v34 = vsel %vm1178_vm0, %v1091_v46, 0.0  ;;  %v1197_v43 = vmul.f32 %v1091_v46, %v1091_v46 }
 0x13e   : > { %v1187_v41 = vadd.f32 %v1186_v34, %v1185_v33 }
 0x13f   : > { %v1179_v22 = vsel %vm1178_vm0, %v1052_v45, %v1176_v48  ;;  %v1201_v56 = vsel %vm1178_vm0, %v1197_v43, 0.0 }
 0x140   : > { %1183 = vst [vmem:[%s2357_s13] sm:$0xff] %v1179_v22  ;;  %v1079_v25 = vpop.f32.mrf.mxu0  ;;  %v1202_v60 = vadd.f32 %v1201_v56, %v1200_v55 }
 0x141   : > { %v1116_v24 = vpop.f32.mrf.mxu3  ;;  %v1092_v26 = vpop.f32.mrf.mxu1 }
 0x142   : > { %v1103_v23 = vpop.f32.mrf.mxu2 }
 0x143   : > { %v1117_v31 = vadd.f32 %v1116_v24, %v1103_v23 }
 0x149   : > { %v1118_v28 = vpop.f32.mrf.mxu3 }
 0x14a   : > { %v1105_v27 = vpop.f32.mrf.mxu2 }
 0x158   : > { %v1129_v29 = vpop.f32.mrf.mxu0 }
 0x159   : > { %v1142_v30 = vpop.f32.mrf.mxu1  ;;  %v1130_v32 = vadd.f32 %v1129_v29, %v1117_v31 }
 0x15b   : > { %v1188_v39 = vsel %vm1178_vm0, %v1130_v32, 0.0  ;;  %v1198_v49 = vmul.f32 %v1130_v32, %v1130_v32 }
 0x15c   : > { %v1189_v47 = vadd.f32 %v1188_v39, %v1187_v41 }
 0x15d   : > { %v1203_v59 = vsel %vm1178_vm0, %v1198_v49, 0.0 }
 0x15e   : > { %v1204_v62 = vadd.f32 %v1203_v59, %v1202_v60 }
 0x15f   : > { %v1168_v37 = vpop.f32.mrf.mxu3 }
 0x160   : > { %v1155_v35 = vpop.f32.mrf.mxu2  ;;  %v1131_v38 = vpop.f32.mrf.mxu0 }
 0x161   : > { %v1156_v36 = vadd.f32 %v1155_v35, %v1142_v30  ;;  %v1144_v40 = vpop.f32.mrf.mxu1 }
 0x163   : > { %v1169_v44 = vadd.f32 %v1168_v37, %v1156_v36 }
 0x165   : > { %v1177_v50 = vrot.slane %v1169_v44, 4  ;;  %v1190_v51 = vsel %vm1178_vm0, %v1169_v44, 0.0  ;;  %v1199_v54 = vmul.f32 %v1169_v44, %v1169_v44 }
 0x166   : > { %v1191_v52 = vadd.f32 %v1190_v51, %v1189_v47 }
 0x167   : > { %v1180_v53 = vsel %vm1178_vm0, %v1130_v32, %v1177_v50  ;;  %v1170_v58 = vpop.f32.mrf.mxu3  ;;  %v1205_v61 = vsel %vm1178_vm0, %v1199_v54, 0.0 }
 0x168   : > { %1184 = vst [vmem:[%s2357_s13 + $0x8] sm:$0xff] %v1180_v53  ;;  %v1157_v57 = vpop.f32.mrf.mxu2  ;;  %1192 = vadd.xlane.f32.xlu0 %v1191_v52  ;;  %v1206_v63 = vadd.f32 %v1205_v61, %v1204_v62 }
 0x170   : > { %1207 = vadd.xlane.f32.xlu0 %v1206_v63 }
 0x1db   : > { %v1193_v0 = vpop.xlane.xlu0 %1192 }
 0x1dc   : > { %1195 = vst.msk [vmem:[%s426_s20] sm:$0xf] %vm1194_vm1, %v1193_v0 }
 0x1e3   : > { %v1208_v1 = vpop.xlane.xlu0 %1207 }
 0x1e4   : > { %1209 = vst.msk [vmem:[%s430_s24] sm:$0xf] %vm1194_vm1, %v1208_v1 }
 0x1e5 PF: > { %p12_p10 = scmp.ge.s32.totalorder %s1922_s19, 4   ;;  %s2394_s15 = smov %s1872_s16 }
 0x1e6   : > { %s2395_s16 = smov %s1931_s22  ;;  %s2396_s17 = smov %s1922_s19 }
 0x1e7   :  { %14 = sbr.rel (!%p12_p10) target bundleno = 2 (0x2), region = 110 }

// kernel: unet_up3_ct_forward.6
= control target key start
LH: loop header
LB: loop body
LE: loop exit
PB: predicated region body
PF: predicated region fallthrough
CT: control target
= control target key end

     0   :  { %s959_s15 = smov 0   ;;  %s961_s16 = smov 0   ;;  %s1167_s0 = inlined_call_operand.vmem [shape: bf16[128,1024], index: 0, kind: input, shape index: {}]   ;;  %s1168_s1 = inlined_call_operand.vmem [shape: bf16[4,128], index: 1, kind: input, shape index: {}]   ;;  %s1169_s2 = inlined_call_operand.vmem [shape: f32[4,1024], index: 2, kind: output, shape index: {0}]   ;;  %s1170_s3 = inlined_call_operand.vmem [shape: f32[2,4,1], index: 3, kind: output, shape index: {1}]   ;;  %s1171_s4 = inlined_call_operand.vmem [shape: f32[2,4,1], index: 4, kind: output, shape index: {2}]  }
   0x1   :  { %s963_s17 = smov 0  }
   0x2 LB: > { %s975_s18 = sadd.s32 4294967295, %s932_s17   ;;  %s978_s19 = sadd.s32 1, %s932_s17   ;;  %s932_s17 = sphi %s963_s17, %s1174_s17   ;;  %s928_s16 = sphi %s961_s16, %s1173_s16   ;;  %s924_s15 = sphi %s959_s15, %s1172_s15  }
   0x3   : > { %s19_s20 = ssub.s32 %s932_s17, %s978_s19  ;;  %s22_s21 = sadd.s32 1, %s928_s16 }
   0x4   : > { %p20_p0 = scmp.eq.s32.totalorder %s19_s20, 0  ;;  %p29_p1 = scmp.ne.s32.totalorder %s928_s16, %s924_s15 }
   0x5   : > { %p30_p2 = scmp.eq.s32.totalorder %s932_s17, 0  ;;  %p713_p4 = scmp.ge.s32.totalorder %s932_s17, 2 }
   0x6   : > { %s987_s22 = scalar_select %p20_p0, %s928_s16, %s22_s21  }
   0x7   : > { %p31_p3 = por %p30_p2, %p29_p1  ;;  %157 = sbr.rel (%p713_p4) target bundleno = 48 (0x30), region = 20 }
   0xc   : > { %160 = sbr.rel (!%p31_p3) target bundleno = 48 (0x30), region = 24  ;;  %s162_s23 = sand.u32 (%p31_p3), 1, %s928_s16  }
   0xd   : > { %s853_s24 = sshll.u32 (%p31_p3), %s932_s17, 4  ;;  %s714_s25 = sshll.u32 (%p31_p3), %s162_s23, 8 }
   0xe   : > { %s995_s28 = scalar_lea.vmem (%p31_p3), %s1167_s0, %s853_s24  ;;  %s1000_s29 = scalar_lea.vmem (%p31_p3), [#allocation2], %s714_s25 }
   0xf   : > { %v180_v0 = vld [vmem:[%s995_s28] sm:$0xff] (%p31_p3)  ;;  %v182_v1 = vld [vmem:[%s995_s28 + $0x8] sm:$0xff] (%p31_p3) }
  0x10   : > { %v184_v2 = vld [vmem:[%s995_s28 + $0x20] sm:$0xff] (%p31_p3)  ;;  %181 = vst [vmem:[%s1000_s29] sm:$0xff] (%p31_p3), %v180_v0  ;;  %v186_v3 = vld [vmem:[%s995_s28 + $0x28] sm:$0xff] (%p31_p3) }
  0x11   : > { %183 = vst [vmem:[%s1000_s29 + $0x8] sm:$0xff] %v182_v1  ;;  %v188_v4 = vld [vmem:[%s995_s28 + $0x40] sm:$0xff]  ;;  %v190_v5 = vld [vmem:[%s995_s28 + $0x48] sm:$0xff] }
  0x12   : > { %185 = vst [vmem:[%s1000_s29 + $0x10] sm:$0xff] %v184_v2  ;;  %v192_v6 = vld [vmem:[%s995_s28 + $0x60] sm:$0xff]  ;;  %v194_v7 = vld [vmem:[%s995_s28 + $0x68] sm:$0xff] }
  0x13   : > { %187 = vst [vmem:[%s1000_s29 + $0x18] sm:$0xff] %v186_v3  ;;  %v196_v8 = vld [vmem:[%s995_s28 + $0x80] sm:$0xff]  ;;  %v198_v9 = vld [vmem:[%s995_s28 + $0x88] sm:$0xff] }
  0x14   : > { %189 = vst [vmem:[%s1000_s29 + $0x20] sm:$0xff] %v188_v4  ;;  %v200_v10 = vld [vmem:[%s995_s28 + $0xa0] sm:$0xff]  ;;  %v202_v11 = vld [vmem:[%s995_s28 + $0xa8] sm:$0xff] }
  0x15   : > { %191 = vst [vmem:[%s1000_s29 + $0x28] sm:$0xff] %v190_v5  ;;  %v204_v12 = vld [vmem:[%s995_s28 + $0xc0] sm:$0xff]  ;;  %v206_v13 = vld [vmem:[%s995_s28 + $0xc8] sm:$0xff] }
  0x16   : > { %193 = vst [vmem:[%s1000_s29 + $0x30] sm:$0xff] %v192_v6  ;;  %v208_v14 = vld [vmem:[%s995_s28 + $0xe0] sm:$0xff]  ;;  %v210_v15 = vld [vmem:[%s995_s28 + $0xe8] sm:$0xff] }
  0x17   : > { %195 = vst [vmem:[%s1000_s29 + $0x38] sm:$0xff] %v194_v7  ;;  %v212_v16 = vld [vmem:[%s995_s28 + $0x100] sm:$0xff]  ;;  %v214_v17 = vld [vmem:[%s995_s28 + $0x108] sm:$0xff] }
  0x18   : > { %197 = vst [vmem:[%s1000_s29 + $0x40] sm:$0xff] %v196_v8  ;;  %v216_v18 = vld [vmem:[%s995_s28 + $0x120] sm:$0xff]  ;;  %v218_v19 = vld [vmem:[%s995_s28 + $0x128] sm:$0xff] }
  0x19   : > { %199 = vst [vmem:[%s1000_s29 + $0x48] sm:$0xff] %v198_v9  ;;  %v220_v20 = vld [vmem:[%s995_s28 + $0x140] sm:$0xff]  ;;  %v222_v21 = vld [vmem:[%s995_s28 + $0x148] sm:$0xff] }
  0x1a   : > { %201 = vst [vmem:[%s1000_s29 + $0x50] sm:$0xff] %v200_v10  ;;  %v224_v22 = vld [vmem:[%s995_s28 + $0x160] sm:$0xff]  ;;  %v226_v23 = vld [vmem:[%s995_s28 + $0x168] sm:$0xff] }
  0x1b   : > { %203 = vst [vmem:[%s1000_s29 + $0x58] sm:$0xff] %v202_v11  ;;  %v228_v24 = vld [vmem:[%s995_s28 + $0x180] sm:$0xff]  ;;  %v230_v25 = vld [vmem:[%s995_s28 + $0x188] sm:$0xff] }
  0x1c   : > { %205 = vst [vmem:[%s1000_s29 + $0x60] sm:$0xff] %v204_v12  ;;  %v232_v26 = vld [vmem:[%s995_s28 + $0x1a0] sm:$0xff]  ;;  %v234_v27 = vld [vmem:[%s995_s28 + $0x1a8] sm:$0xff] }
  0x1d   : > { %207 = vst [vmem:[%s1000_s29 + $0x68] sm:$0xff] %v206_v13  ;;  %v236_v28 = vld [vmem:[%s995_s28 + $0x1c0] sm:$0xff]  ;;  %v238_v29 = vld [vmem:[%s995_s28 + $0x1c8] sm:$0xff] }
  0x1e   : > { %209 = vst [vmem:[%s1000_s29 + $0x70] sm:$0xff] %v208_v14  ;;  %v240_v30 = vld [vmem:[%s995_s28 + $0x1e0] sm:$0xff]  ;;  %v242_v31 = vld [vmem:[%s995_s28 + $0x1e8] sm:$0xff] }
  0x1f   : > { %211 = vst [vmem:[%s1000_s29 + $0x78] sm:$0xff] %v210_v15 }
  0x20   : > { %213 = vst [vmem:[%s1000_s29 + $0x80] sm:$0xff] %v212_v16 }
  0x21   : > { %215 = vst [vmem:[%s1000_s29 + $0x88] sm:$0xff] %v214_v17 }
  0x22   : > { %217 = vst [vmem:[%s1000_s29 + $0x90] sm:$0xff] %v216_v18 }
  0x23   : > { %219 = vst [vmem:[%s1000_s29 + $0x98] sm:$0xff] %v218_v19 }
  0x24   : > { %221 = vst [vmem:[%s1000_s29 + $0xa0] sm:$0xff] %v220_v20 }
  0x25   : > { %223 = vst [vmem:[%s1000_s29 + $0xa8] sm:$0xff] %v222_v21 }
  0x26   : > { %225 = vst [vmem:[%s1000_s29 + $0xb0] sm:$0xff] %v224_v22 }
  0x27   : > { %227 = vst [vmem:[%s1000_s29 + $0xb8] sm:$0xff] %v226_v23 }
  0x28   : > { %229 = vst [vmem:[%s1000_s29 + $0xc0] sm:$0xff] %v228_v24 }
  0x29   : > { %231 = vst [vmem:[%s1000_s29 + $0xc8] sm:$0xff] %v230_v25 }
  0x2a   : > { %233 = vst [vmem:[%s1000_s29 + $0xd0] sm:$0xff] %v232_v26 }
  0x2b   : > { %235 = vst [vmem:[%s1000_s29 + $0xd8] sm:$0xff] %v234_v27 }
  0x2c   : > { %237 = vst [vmem:[%s1000_s29 + $0xe0] sm:$0xff] %v236_v28 }
  0x2d   : > { %239 = vst [vmem:[%s1000_s29 + $0xe8] sm:$0xff] %v238_v29 }
  0x2e   : > { %241 = vst [vmem:[%s1000_s29 + $0xf0] sm:$0xff] %v240_v30 }
  0x2f   : > { %243 = vst [vmem:[%s1000_s29 + $0xf8] sm:$0xff] %v242_v31 }
  0x30 PF: > { %p717_p5 = scmp.ge.s32.totalorder %s932_s17, 1  ;;  %p248_p6 = scmp.lt.s32.totalorder %s932_s17, 3 }
  0x32   : > { %p249_p7 = pnand %p717_p5, %p248_p6 }
  0x33   : > { %s255_s30 = sand.u32 (!%p249_p7), 1, %s924_s15   ;;  %s719_s9 = sshll.u32 (!%p249_p7), %s975_s18, 2 }
  0x34   : > { %252 = sbr.rel (%p249_p7) target bundleno = 354 (0x162), region = 47  ;;  %s718_s5 = sshll.u32 (!%p249_p7), %s255_s30, 8 }
  0x35   : > { %s1066_s6 = scalar_lea.vmem (!%p249_p7), [#allocation2], %s718_s5  ;;  %p290_p8 = scmp.lt.s32.totalorder (!%p249_p7), %s719_s9, 7 }
  0x36   : > { %p295_p9 = scmp.lt.s32.totalorder (!%p249_p7), %s975_s18, 1 }
  0x39   : > { %v837_v32 = vld [vmem:[%s1066_s6 + $0xe0] sm:$0xf]  ;;  %v884_v33 = vld [vmem:[%s1066_s6 + $0xec] sm:$0xf0]  ;;  %v882_v34 = vld [vmem:[%s1066_s6 + $0xe4] sm:$0xf] }
  0x3a   : > { %v838_v35 = vor.u32 %v884_v33, %v837_v32  ;;  %v839_v36 = vld [vmem:[%s1066_s6 + $0xf0] sm:$0xf0]  ;;  %v845_v37 = vld [vmem:[%s1066_s6 + $0xe8] sm:$0xf]  ;;  %v885_v38 = vld [vmem:[%s1066_s6 + $0xf4] sm:$0xf0] }
  0x3b   : > { %v842_v39 = vor.u32 %v882_v34, %v839_v36  ;;  %v846_v40 = vor.u32 %v885_v38, %v845_v37  ;;  %v883_v41 = vld [vmem:[%s1066_s6 + $0xec] sm:$0xf]  ;;  %v847_v42 = vld [vmem:[%s1066_s6 + $0xf8] sm:$0xf0]  ;;  %v821_v43 = vld [vmem:[%s1066_s6 + $0xc0] sm:$0xf] }
  0x3c   : > { %496 = vmatpush.bf16.msra.mxu0 %v838_v35  ;;  %v850_v44 = vor.u32 %v883_v41, %v847_v42  ;;  %v880_v45 = vld [vmem:[%s1066_s6 + $0xcc] sm:$0xf0]  ;;  %v878_v46 = vld [vmem:[%s1066_s6 + $0xc4] sm:$0xf]  ;;  %v823_v47 = vld [vmem:[%s1066_s6 + $0xd0] sm:$0xf0] }
  0x3d   : > { %509 = vmatpush.bf16.msra.mxu1 %v842_v39  ;;  %522 = vmatpush.bf16.msra.mxu2 %v846_v40  ;;  %v822_v48 = vor.u32 %v880_v45, %v821_v43  ;;  %v826_v49 = vor.u32 %v878_v46, %v823_v47  ;;  %v829_v50 = vld [vmem:[%s1066_s6 + $0xc8] sm:$0xf]  ;;  %v881_v51 = vld [vmem:[%s1066_s6 + $0xd4] sm:$0xf0]  ;;  %v879_v52 = vld [vmem:[%s1066_s6 + $0xcc] sm:$0xf] }
  0x3e   : > { %535 = vmatpush.bf16.msra.mxu3 %v850_v44  ;;  %v830_v53 = vor.u32 %v881_v51, %v829_v50  ;;  %v831_v54 = vld [vmem:[%s1066_s6 + $0xd8] sm:$0xf0]  ;;  %v805_v55 = vld [vmem:[%s1066_s6 + $0xa0] sm:$0xf]  ;;  %v876_v56 = vld [vmem:[%s1066_s6 + $0xac] sm:$0xf0] }
  0x3f   : > { %v834_v57 = vor.u32 %v879_v52, %v831_v54  ;;  %v874_v58 = vld [vmem:[%s1066_s6 + $0xa4] sm:$0xf]  ;;  %v807_v59 = vld [vmem:[%s1066_s6 + $0xb0] sm:$0xf0]  ;;  %v813_v60 = vld [vmem:[%s1066_s6 + $0xa8] sm:$0xf]  ;;  %v806_v61 = vor.u32 %v876_v56, %v805_v55 }
  0x40   : > { %497 = vmatpush.bf16.msra.mxu0 %v822_v48  ;;  %v877_v62 = vld [vmem:[%s1066_s6 + $0xb4] sm:$0xf0]  ;;  %v875_v63 = vld [vmem:[%s1066_s6 + $0xac] sm:$0xf]  ;;  %v815_v0 = vld [vmem:[%s1066_s6 + $0xb8] sm:$0xf0]  ;;  %v810_v1 = vor.u32 %v874_v58, %v807_v59 }
  0x41   : > { %510 = vmatpush.bf16.msra.mxu1 %v826_v49  ;;  %523 = vmatpush.bf16.msra.mxu2 %v830_v53  ;;  %v814_v2 = vor.u32 %v877_v62, %v813_v60  ;;  %v789_v3 = vld [vmem:[%s1066_s6 + $0x80] sm:$0xf]  ;;  %v872_v4 = vld [vmem:[%s1066_s6 + $0x8c] sm:$0xf0]  ;;  %v870_v5 = vld [vmem:[%s1066_s6 + $0x84] sm:$0xf]  ;;  %v818_v6 = vor.u32 %v875_v63, %v815_v0 }
  0x42   : > { %536 = vmatpush.bf16.msra.mxu3 %v834_v57  ;;  %v791_v7 = vld [vmem:[%s1066_s6 + $0x90] sm:$0xf0]  ;;  %v797_v8 = vld [vmem:[%s1066_s6 + $0x88] sm:$0xf]  ;;  %v873_v9 = vld [vmem:[%s1066_s6 + $0x94] sm:$0xf0]  ;;  %v790_v12 = vor.u32 %v872_v4, %v789_v3 }
  0x43   : > { %v871_v10 = vld [vmem:[%s1066_s6 + $0x8c] sm:$0xf]  ;;  %v799_v11 = vld [vmem:[%s1066_s6 + $0x98] sm:$0xf0]  ;;  %v794_v13 = vor.u32 %v870_v5, %v791_v7  ;;  %v798_v14 = vor.u32 %v873_v9, %v797_v8  ;;  %v773_v15 = vld [vmem:[%s1066_s6 + $0x60] sm:$0xf] }
  0x44   : > { %498 = vmatpush.bf16.msra.mxu0 %v806_v61  ;;  %v868_v16 = vld [vmem:[%s1066_s6 + $0x6c] sm:$0xf0]  ;;  %v866_v17 = vld [vmem:[%s1066_s6 + $0x64] sm:$0xf]  ;;  %v802_v18 = vor.u32 %v871_v10, %v799_v11  ;;  %v775_v19 = vld [vmem:[%s1066_s6 + $0x70] sm:$0xf0] }
  0x45   : > { %511 = vmatpush.bf16.msra.mxu1 %v810_v1  ;;  %524 = vmatpush.bf16.msra.mxu2 %v814_v2  ;;  %v781_v20 = vld [vmem:[%s1066_s6 + $0x68] sm:$0xf]  ;;  %v869_v21 = vld [vmem:[%s1066_s6 + $0x74] sm:$0xf0]  ;;  %v867_v22 = vld [vmem:[%s1066_s6 + $0x6c] sm:$0xf]  ;;  %v774_v24 = vor.u32 %v868_v16, %v773_v15  ;;  %v778_v25 = vor.u32 %v866_v17, %v775_v19 }
  0x46   : > { %537 = vmatpush.bf16.msra.mxu3 %v818_v6  ;;  %v783_v23 = vld [vmem:[%s1066_s6 + $0x78] sm:$0xf0]  ;;  %v782_v26 = vor.u32 %v869_v21, %v781_v20  ;;  %v757_v27 = vld [vmem:[%s1066_s6 + $0x40] sm:$0xf]  ;;  %v864_v28 = vld [vmem:[%s1066_s6 + $0x4c] sm:$0xf0] }
  0x47   : > { %v862_v29 = vld [vmem:[%s1066_s6 + $0x44] sm:$0xf]  ;;  %v786_v30 = vor.u32 %v867_v22, %v783_v23  ;;  %v759_v31 = vld [vmem:[%s1066_s6 + $0x50] sm:$0xf0]  ;;  %v765_v32 = vld [vmem:[%s1066_s6 + $0x48] sm:$0xf]  ;;  %v758_v36 = vor.u32 %v864_v28, %v757_v27 }
  0x48   : > { %499 = vmatpush.bf16.msra.mxu0 %v790_v12  ;;  %v865_v33 = vld [vmem:[%s1066_s6 + $0x54] sm:$0xf0]  ;;  %v863_v34 = vld [vmem:[%s1066_s6 + $0x4c] sm:$0xf]  ;;  %v767_v35 = vld [vmem:[%s1066_s6 + $0x58] sm:$0xf0]  ;;  %v762_v37 = vor.u32 %v862_v29, %v759_v31 }
  0x49   : > { %512 = vmatpush.bf16.msra.mxu1 %v794_v13  ;;  %525 = vmatpush.bf16.msra.mxu2 %v798_v14  ;;  %v766_v38 = vor.u32 %v865_v33, %v765_v32  ;;  %v741_v39 = vld [vmem:[%s1066_s6 + $0x20] sm:$0xf]  ;;  %v860_v40 = vld [vmem:[%s1066_s6 + $0x2c] sm:$0xf0]  ;;  %v858_v41 = vld [vmem:[%s1066_s6 + $0x24] sm:$0xf]  ;;  %v770_v42 = vor.u32 %v863_v34, %v767_v35 }
  0x4a   : > { %538 = vmatpush.bf16.msra.mxu3 %v802_v18  ;;  %v743_v43 = vld [vmem:[%s1066_s6 + $0x30] sm:$0xf0]  ;;  %v749_v44 = vld [vmem:[%s1066_s6 + $0x28] sm:$0xf]  ;;  %v861_v45 = vld [vmem:[%s1066_s6 + $0x34] sm:$0xf0]  ;;  %v742_v48 = vor.u32 %v860_v40, %v741_v39 }
  0x4b   : > { %v859_v46 = vld [vmem:[%s1066_s6 + $0x2c] sm:$0xf]  ;;  %v751_v47 = vld [vmem:[%s1066_s6 + $0x38] sm:$0xf0]  ;;  %v746_v49 = vor.u32 %v858_v41, %v743_v43  ;;  %v750_v50 = vor.u32 %v861_v45, %v749_v44  ;;  %v725_v51 = vld [vmem:[%s1066_s6] sm:$0xf] }
  0x4c   : > { %500 = vmatpush.bf16.msra.mxu0 %v774_v24  ;;  %v856_v52 = vld [vmem:[%s1066_s6 + $0xc] sm:$0xf0]  ;;  %v854_v53 = vld [vmem:[%s1066_s6 + $0x4] sm:$0xf]  ;;  %v754_v54 = vor.u32 %v859_v46, %v751_v47  ;;  %v727_v55 = vld [vmem:[%s1066_s6 + $0x10] sm:$0xf0] }
  0x4d   : > { %513 = vmatpush.bf16.msra.mxu1 %v778_v25  ;;  %526 = vmatpush.bf16.msra.mxu2 %v782_v26  ;;  %v733_v56 = vld [vmem:[%s1066_s6 + $0x8] sm:$0xf]  ;;  %v857_v57 = vld [vmem:[%s1066_s6 + $0x14] sm:$0xf0]  ;;  %v855_v58 = vld [vmem:[%s1066_s6 + $0xc] sm:$0xf]  ;;  %v726_v60 = vor.u32 %v856_v52, %v725_v51  ;;  %v730_v61 = vor.u32 %v854_v53, %v727_v55 }
  0x4e   : > { %539 = vmatpush.bf16.msra.mxu3 %v786_v30  ;;  %v735_v59 = vld [vmem:[%s1066_s6 + $0x18] sm:$0xf0]  ;;  %v734_v62 = vor.u32 %v857_v57, %v733_v56  ;;  %v303_v0 = vld [vmem:[%s1168_s1] sm:$0x3]  ;;  %s1176_s9 = smov (!%p290_p8, %s719_s9), 7  ;;  %vm554_vm0 = vcmask 1043456  }
  0x4f   : > { %v738_v63 = vor.u32 %v855_v58, %v735_v59  ;;  %s720_s10 = sshll.u32 %s1176_s9, 2  ;;  %s1178_s18 = smov (!%p295_p9, %s975_s18), 1  ;;  %vm570_vm1 = vcmask 3072  }
  0x50   : > { %501 = vmatpush.bf16.msra.mxu0 %v758_v36  ;;  %s293_s13 = scalar_lea.vmem %s1169_s2, %s720_s10  ;;  %s721_s14 = sshll.u32 %s1178_s18, 2 }
  0x51   : > { %514 = vmatpush.bf16.msra.mxu1 %v762_v37  ;;  %527 = vmatpush.bf16.msra.mxu2 %v766_v38  ;;  %s298_s20 = scalar_lea.vmem %s1170_s3, %s721_s14  ;;  %s302_s24 = scalar_lea.vmem %s1171_s4, %s721_s14 }
  0x52   : > { %540 = vmatpush.bf16.msra.mxu3 %v770_v42 }
  0x54   : > { %502 = vmatpush.bf16.msra.mxu0 %v742_v48 }
  0x55   : > { %515 = vmatpush.bf16.msra.mxu1 %v746_v49  ;;  %528 = vmatpush.bf16.msra.mxu2 %v750_v50 }
  0x56   : > { %541 = vmatpush.bf16.msra.mxu3 %v754_v54 }
  0x58   : > { %503 = vmatpush.bf16.msra.mxu0 %v726_v60 }
  0x59   : > { %516 = vmatpush.bf16.msra.mxu1 %v730_v61  ;;  %529 = vmatpush.bf16.msra.mxu2 %v734_v62 }
  0x5a   : > { %542 = vmatpush.bf16.msra.mxu3 %v738_v63 }
  0x5b   : > { %504 = vmatmul.bf16.vlgmr.msra.gmra.mxu0 %v303_v0 }
  0x5c   : > { %517 = vmatmul.bf16.vlgmr.msra.gmra.mxu1 %v303_v0  ;;  %530 = vmatmul.bf16.vlgmr.msra.gmra.mxu2 %v303_v0 }
  0x5d   : > { %543 = vmatmul.bf16.vlgmr.msra.gmra.mxu3 %v303_v0 }
  0xd8   : > { %v505_v1 = vpop.f32.mrf.mxu0 }
  0xd9   : > { %v518_v2 = vpop.f32.mrf.mxu1  ;;  %v561_v3 = vsel %vm554_vm0, %v505_v1, 0.0  ;;  %v572_v6 = vmul.f32 %v505_v1, %v505_v1 }
  0xda   : > { %v552_v4 = vrot.slane %v518_v2, 4  ;;  %v562_v5 = vsel %vm554_vm0, %v518_v2, 0.0  ;;  %v573_v8 = vmul.f32 %v518_v2, %v518_v2 }
  0xdb   : > { %v563_v9 = vadd.f32 %v562_v5, %v561_v3  ;;  %v576_v11 = vsel %vm554_vm0, %v572_v6, 0.0 }
  0xdc   : > { %v555_v7 = vsel %vm554_vm0, %v505_v1, %v552_v4  ;;  %v577_v12 = vsel %vm554_vm0, %v573_v8, 0.0 }
  0xdd   : > { %559 = vst [vmem:[%s293_s13] sm:$0xff] %v555_v7  ;;  %v578_v23 = vadd.f32 %v577_v12, %v576_v11 }
  0xdf   : > { %v531_v10 = vpop.f32.mrf.mxu2 }
  0xe0   : > { %v574_v13 = vmul.f32 %v531_v10, %v531_v10  ;;  %v544_v14 = vpop.f32.mrf.mxu3  ;;  %v507_v15 = vpop.f32.mrf.mxu0  ;;  %v564_v16 = vsel %vm554_vm0, %v531_v10, 0.0 }
  0xe1   : > { %v553_v17 = vrot.slane %v544_v14, 4  ;;  %v520_v18 = vpop.f32.mrf.mxu1  ;;  %v565_v19 = vadd.f32 %v564_v16, %v563_v9  ;;  %v566_v20 = vsel %vm554_vm0, %v544_v14, 0.0  ;;  %v575_v24 = vmul.f32 %v544_v14, %v544_v14 }
  0xe2   : > { %v579_v25 = vsel %vm554_vm0, %v574_v13, 0.0 }
  0xe3   : > { %v556_v21 = vsel %vm554_vm0, %v531_v10, %v553_v17  ;;  %v567_v22 = vadd.f32 %v566_v20, %v565_v19  ;;  %v580_v27 = vadd.f32 %v579_v25, %v578_v23  ;;  %v581_v29 = vsel %vm554_vm0, %v575_v24, 0.0 }
  0xe4   : > { %560 = vst [vmem:[%s293_s13 + $0x8] sm:$0xff] %v556_v21 }
  0xe5   : > { %568 = vadd.xlane.f32.xlu0 %v567_v22  ;;  %v582_v30 = vadd.f32 %v581_v29, %v580_v27 }
  0xe7   : > { %v533_v26 = vpop.f32.mrf.mxu2 }
  0xe8   : > { %v546_v28 = vpop.f32.mrf.mxu3 }
  0xed   : > { %583 = vadd.xlane.f32.xlu0 %v582_v30 }
 0x158   : > { %v569_v31 = vpop.xlane.xlu0 %568 }
 0x159   : > { %571 = vst.msk [vmem:[%s298_s20] sm:$0xf] %vm570_vm1, %v569_v31 }
 0x160   : > { %v584_v32 = vpop.xlane.xlu0 %583 }
 0x161   : > { %585 = vst.msk [vmem:[%s302_s24] sm:$0xf] %vm570_vm1, %v584_v32 }
 0x162 PF: > { %p12_p10 = scmp.ge.s32.totalorder %s978_s19, 4   ;;  %s1172_s15 = smov %s928_s16 }
 0x163   : > { %s1173_s16 = smov %s987_s22  ;;  %s1174_s17 = smov %s978_s19 }
 0x164   :  { %14 = sbr.rel (!%p12_p10) target bundleno = 2 (0x2), region = 110 }

</bundles_post_ra>
